<compile_context>
chip_gen: v5e
topology: v5e:2x2
jax: 0.10.0
libtpu: 0.0.40
codegen_flags: <defaults>
</compile_context>

<pallas_src>
import functools

import jax
import jax.numpy as jnp
from jax.experimental import pallas as pl
from jax.experimental.pallas import tpu as pltpu


_PH = 128  # padded per-head lane slab width


# ----------------------------------------------------------------------------
# Fused two-layer kernel (one grid step == one graph)
# ----------------------------------------------------------------------------
def _tgcn2_kernel(x_ref, bias_ref, w1_ref, b1_ref, g1_ref, be1_ref,
                  w2_ref, b2_ref, out_ref, h1_ref,
                  *, heads1, d1, heads2, d2, ph, n_real):
    f32 = jnp.float32
    bf16 = jnp.bfloat16

    x = x_ref[0]                       # [N, Fin]  bf16
    bias = bias_ref[0]                 # [N, N]    bf16 additive mask: 0 on edge, -1e30 off
    n_pad = bias.shape[0]

    # Row masks derived in-kernel (no extra input DMAs).
    row_ids = jax.lax.broadcasted_iota(jnp.int32, (n_pad, 1), 0)
    mask_real = (row_ids < n_real).astype(f32)                       # real (non-padded) rows
    row_has_edge = (jnp.max(bias, axis=-1, keepdims=True) > -1.0).astype(f32)

    def attention(x_bf16, w_ref, b_ref, heads, d_head, store):
        # One fused MXU matmul -> [N, 4*heads*ph] laid out as [q | k | v | skip],
        # each head occupying a 128-lane slab (real features in its first d_head lanes).
        proj = jnp.dot(x_bf16, w_ref[...], preferred_element_type=f32) + b_ref[...]
        hp = heads * ph
        scale = 1.0 / (float(d_head) ** 0.5)
        for h in range(heads):         # heads is tiny & static (3 / 1)
            lo = h * ph
            qh = proj[:, lo:lo + ph].astype(bf16)
            kh = proj[:, hp + lo:hp + lo + ph].astype(bf16)
            vh = proj[:, 2 * hp + lo:2 * hp + lo + ph].astype(bf16)
            scores = jax.lax.dot_general(   # q . k^T without a transpose op
                qh, kh, (((1,), (1,)), ((), ())),
                preferred_element_type=f32) * scale
            masked = scores + bias          # off-edge entries -> exp underflows to exact 0
            m = jnp.max(masked, axis=-1, keepdims=True)
            p = jnp.exp(masked - m)
            denom = jnp.sum(p, axis=-1, keepdims=True)   # always >= 1 (exp(0) at the max)
            alpha = p * pl.reciprocal(denom, approx=True)
            agg = jnp.dot(alpha.astype(bf16), vh, preferred_element_type=f32)
            # edge-less / padded rows aggregate to 0 (PyG: no messages), then add skip
            store(h, agg * row_has_edge + proj[:, 3 * hp + lo:3 * hp + lo + ph])

    # ---- layer 1: attention, stored per-head into 128-lane slabs of VMEM scratch ----
    def store_l1(h, val):
        h1_ref[:, h * ph:(h + 1) * ph] = val
    attention(x, w1_ref, b1_ref, heads1, d1, store_l1)

    # BatchNorm1d (training-mode stats over real rows) + ReLU, all in f32.
    y = h1_ref[...]
    inv_n = 1.0 / float(n_real)
    mean = jnp.sum(y * mask_real, axis=0, keepdims=True) * inv_n
    cen = y - mean
    var = jnp.sum(cen * cen * mask_real, axis=0, keepdims=True) * inv_n
    h1 = cen * jax.lax.rsqrt(var + 1e-5) * g1_ref[...] + be1_ref[...]
    h1 = jnp.maximum(h1, 0.0).astype(bf16)

    # ---- layer 2: attention only (activation='none', no norm); lane-dense stores ----
    def store_l2(h, val):
        out_ref[0, :, h * ph:(h + 1) * ph] = val
    attention(h1, w2_ref, b2_ref, heads2, d2, store_l2)


# ----------------------------------------------------------------------------
# Host-side weight packing (pad each head to a 128-lane slab, fuse q/k/v/skip)
# ----------------------------------------------------------------------------
def _pad_head_cols(w, heads, d):
    # [rows, heads*d] -> [rows, heads*_PH], head h's d real cols lead slab h
    rows = w.shape[0]
    w3 = w.reshape(rows, heads, d)
    return jnp.pad(w3, ((0, 0), (0, 0), (0, _PH - d))).reshape(rows, heads * _PH)


def _pad_head_rows(w, heads_in, d_in):
    # [heads_in*d_in, cols] -> [heads_in*_PH, cols], matching the padded input layout
    cols = w.shape[1]
    w3 = w.reshape(heads_in, d_in, cols)
    return jnp.pad(w3, ((0, 0), (0, _PH - d_in), (0, 0))).reshape(heads_in * _PH, cols)


def pack_layer(p, heads, d, in_heads=None, in_d=None):
    """Fuse + pad {q, k, v, skip} into one bf16 weight and one f32 bias row."""
    def prep(w):
        if in_heads is not None:
            w = _pad_head_rows(w, in_heads, in_d)
        return _pad_head_cols(w, heads, d)
    wcat = jnp.concatenate([prep(p["wq"]), prep(p["wk"]),
                            prep(p["wv"]), prep(p["ws"])], axis=1)
    bcat = jnp.concatenate([_pad_head_cols(p[k], heads, d)
                            for k in ("bq", "bk", "bv", "bs")], axis=1)
    return wcat.astype(jnp.bfloat16), bcat.astype(jnp.float32)


# ----------------------------------------------------------------------------
# Full model forward: one pallas_call, grid over the graph batch
# ----------------------------------------------------------------------------
def transformer_gcn2_forward(x, adj, p1, p2, *, heads1, hidden, heads2, out_features):
    single = (x.ndim == 2)
    if single:
        x, adj = x[None], adj[None]
    num_graphs, n_real, _ = x.shape
    n_pad = ((n_real + 15) // 16) * 16          # bf16 sublane tile = 16 rows
    pad_n = n_pad - n_real

    x_p = jnp.pad(x, ((0, 0), (0, pad_n), (0, 0))).astype(jnp.bfloat16)
    adj_p = jnp.pad(adj, ((0, 0), (0, pad_n), (0, pad_n))).astype(jnp.float32)
    # Additive softmax bias: 0.0 on edges, -1e30 off-graph / padded. bf16 halves HBM+VMEM.
    adj_bias = ((adj_p - 1.0) * 1e30).astype(jnp.bfloat16)

    w1, b1 = pack_layer(p1, heads1, hidden)
    g1 = _pad_head_cols(p1["gamma"], heads1, hidden)
    be1 = _pad_head_cols(p1["beta"], heads1, hidden)
    w2, b2 = pack_layer(p2, heads2, out_features, in_heads=heads1, in_d=hidden)

    kernel = functools.partial(_tgcn2_kernel, heads1=heads1, d1=hidden,
                               heads2=heads2, d2=out_features, ph=_PH, n_real=n_real)

    def per_graph(arr):
        return pl.BlockSpec((1,) + arr.shape[1:], lambda g: (g, 0, 0))

    def shared(arr):
        return pl.BlockSpec(arr.shape, lambda g: (0, 0))

    out_pad = pl.pallas_call(
        kernel,
        out_shape=jax.ShapeDtypeStruct((num_graphs, n_pad, heads2 * _PH), jnp.float32),
        grid=(num_graphs,),
        in_specs=[per_graph(x_p), per_graph(adj_bias),
                  shared(w1), shared(b1), shared(g1), shared(be1),
                  shared(w2), shared(b2)],
        out_specs=pl.BlockSpec((1, n_pad, heads2 * _PH), lambda g: (g, 0, 0)),
        scratch_shapes=[pltpu.VMEM((n_pad, heads1 * _PH), jnp.float32)],
        compiler_params=pltpu.CompilerParams(dimension_semantics=("parallel",)),
    )(x_p, adj_bias, w1, b1, g1, be1, w2, b2)

    # strip node padding and per-head lane padding
    out3 = out_pad[:, :n_real].reshape(num_graphs, n_real, heads2, _PH)[..., :out_features]
    out = out3.reshape(num_graphs, n_real, heads2 * out_features)
    return out[0] if single else out


# ----------------------------------------------------------------------------
# Parameter construction (deterministic, PyTorch-Linear-style uniform init)
# ----------------------------------------------------------------------------
def _init_linear(key, fan_in, fan_out):
    kw, kb = jax.random.split(key)
    lim = 1.0 / (float(fan_in) ** 0.5)
    w = jax.random.uniform(kw, (fan_in, fan_out), jnp.float32, -lim, lim)
    b = jax.random.uniform(kb, (1, fan_out), jnp.float32, -lim, lim)
    return w, b


def init_tgcn_layer(key, in_features, out_features, heads):
    kq, kk, kv, ks = jax.random.split(key, 4)
    hd = heads * out_features
    wq, bq = _init_linear(kq, in_features, hd)
    wk, bk = _init_linear(kk, in_features, hd)
    wv, bv = _init_linear(kv, in_features, hd)
    ws, bs = _init_linear(ks, in_features, hd)     # concat=True -> skip dim = heads*out
    return dict(wq=wq, bq=bq, wk=wk, bk=bk, wv=wv, bv=bv, ws=ws, bs=bs,
                gamma=jnp.ones((1, hd), jnp.float32),
                beta=jnp.zeros((1, hd), jnp.float32))


# ----------------------------------------------------------------------------
# Pure-JAX f32 reference of the same math (unpadded, un-fused)
# ----------------------------------------------------------------------------
def _ref_layer(x, adj, p, heads, d_head, apply_bn, apply_relu):
    q = x @ p["wq"] + p["bq"]
    k = x @ p["wk"] + p["bk"]
    v = x @ p["wv"] + p["bv"]
    outs = []
    for h in range(heads):
        sl = slice(h * d_head, (h + 1) * d_head)
        s = (q[:, sl] @ k[:, sl].T) / (d_head ** 0.5)
        s = jnp.where(adj > 0, s, -1e30)
        pexp = jnp.exp(s - jnp.max(s, -1, keepdims=True)) * adj
        a = pexp / jnp.maximum(jnp.sum(pexp, -1, keepdims=True), 1e-16)
        outs.append(a @ v[:, sl])
    y = jnp.concatenate(outs, -1) + (x @ p["ws"] + p["bs"])
    if apply_bn:
        mu = jnp.mean(y, 0, keepdims=True)
        var = jnp.mean((y - mu) ** 2, 0, keepdims=True)
        y = (y - mu) / jnp.sqrt(var + 1e-5) * p["gamma"] + p["beta"]
    if apply_relu:
        y = jnp.maximum(y, 0.0)
    return y


if __name__ == "__main__":
    # Small, module-consistent shapes; a batch of independent graphs.
    G = 4                    # graphs per call (grid axis, "parallel")
    N, E = 16, 40            # nodes, edges per graph
    in_features = 6
    hidden_feat = 32         # t_gcn1 per-head dim
    out_features = 8         # t_gcn2 per-head dim
    heads1, heads2 = 3, 1    # from _layer1_kwargs / _layer2_kwargs

    key = jax.random.PRNGKey(0)
    kx, ke, kp1, kp2 = jax.random.split(key, 4)

    x = jax.random.normal(kx, (G, N, in_features), jnp.float32)
    edge_keys = jax.random.split(ke, G)
    adjs = []
    for g in range(G):
        ksrc, kdst = jax.random.split(edge_keys[g])
        src = jax.random.randint(ksrc, (E,), 0, N)
        dst = jax.random.randint(kdst, (E,), 0, N)
        # Dense adjacency mask (glue, plain JAX): adj[dst, src] = 1 (message j->i).
        adjs.append(jnp.zeros((N, N), jnp.float32).at[dst, src].set(1.0))
    adj = jnp.stack(adjs)

    p1 = init_tgcn_layer(kp1, in_features, hidden_feat, heads1)
    p2 = init_tgcn_layer(kp2, heads1 * hidden_feat, out_features, heads2)

    out = transformer_gcn2_forward(x, adj, p1, p2,
                                   heads1=heads1, hidden=hidden_feat,
                                   heads2=heads2, out_features=out_features)
    out = jax.block_until_ready(out)

    # Sanity check against the pure-JAX f32 reference (kernel uses bf16 MXU inputs
    # with f32 accumulation, so tolerance is relaxed accordingly).
    assert out.shape == (G, N, heads2 * out_features)
    assert bool(jnp.all(jnp.isfinite(out)))
    for g in range(G):
        ref = _ref_layer(x[g], adj[g], p1, heads1, hidden_feat, True, True)
        ref = _ref_layer(ref, adj[g], p2, heads2, out_features, False, False)
        assert bool(jnp.allclose(out[g], ref, rtol=5e-2, atol=5e-2))

    print("KERNEL_OK")
</pallas_src>

<mosaic_0001>
module attributes {stable_mosaic.version = 11 : i64} {
  func.func @_tgcn2_kernel(%arg0: i32, %arg1: memref<1x16x6xbf16, #tpu.memory_space<vmem>>, %arg2: memref<1x16x16xbf16, #tpu.memory_space<vmem>>, %arg3: memref<6x1536xbf16, #tpu.memory_space<vmem>>, %arg4: memref<1x1536xf32, #tpu.memory_space<vmem>>, %arg5: memref<1x384xf32, #tpu.memory_space<vmem>>, %arg6: memref<1x384xf32, #tpu.memory_space<vmem>>, %arg7: memref<384x512xbf16, #tpu.memory_space<vmem>>, %arg8: memref<1x512xf32, #tpu.memory_space<vmem>>, %arg9: memref<1x16x128xf32, #tpu.memory_space<vmem>>, %arg10: memref<16x384xf32, #tpu.memory_space<vmem>>) attributes {dimension_semantics = [#tpu.dimension_semantics<parallel>], iteration_bounds = array<i64: 4>, scalar_prefetch = 0 : i64, scratch_operands = 1 : i64, tpu.core_type = #tpu.core_type<tc>, window_params = [{transform_indices = @transform_0, window_bounds = array<i64: 1, 16, 6>}, {transform_indices = @transform_1, window_bounds = array<i64: 1, 16, 16>}, {pipeline_mode = #tpu.pipeline_mode<synchronous>, transform_indices = @transform_2, window_bounds = array<i64: 6, 1536>}, {pipeline_mode = #tpu.pipeline_mode<synchronous>, transform_indices = @transform_3, window_bounds = array<i64: 1, 1536>}, {pipeline_mode = #tpu.pipeline_mode<synchronous>, transform_indices = @transform_4, window_bounds = array<i64: 1, 384>}, {pipeline_mode = #tpu.pipeline_mode<synchronous>, transform_indices = @transform_5, window_bounds = array<i64: 1, 384>}, {pipeline_mode = #tpu.pipeline_mode<synchronous>, transform_indices = @transform_6, window_bounds = array<i64: 384, 512>}, {pipeline_mode = #tpu.pipeline_mode<synchronous>, transform_indices = @transform_7, window_bounds = array<i64: 1, 512>}, {transform_indices = @transform_8, window_bounds = array<i64: 1, 16, 128>}]} {
    %c0 = arith.constant 0 : index
    %c0_0 = arith.constant 0 : index
    %c0_1 = arith.constant 0 : index
    %0 = vector.load %arg1[%c0, %c0_0, %c0_1] : memref<1x16x6xbf16, #tpu.memory_space<vmem>>, vector<1x16x6xbf16>
    %1 = vector.shape_cast %0 : vector<1x16x6xbf16> to vector<16x6xbf16>
    %c0_2 = arith.constant 0 : index
    %c0_3 = arith.constant 0 : index
    %c0_4 = arith.constant 0 : index
    %2 = vector.load %arg2[%c0_2, %c0_3, %c0_4] : memref<1x16x16xbf16, #tpu.memory_space<vmem>>, vector<1x16x16xbf16>
    %3 = vector.shape_cast %2 : vector<1x16x16xbf16> to vector<16x16xbf16>
    %4 = tpu.iota {dimensions = array<i32: 0>} : vector<16x1xi32>
    %c16_i32 = arith.constant 16 : i32
    %5 = vector.broadcast %c16_i32 : i32 to vector<16x1xi32>
    %6 = arith.cmpi slt, %4, %5 : vector<16x1xi32>
    %7 = arith.extui %6 : vector<16x1xi1> to vector<16x1xi32>
    %8 = arith.sitofp %7 : vector<16x1xi32> to vector<16x1xf32>
    %cst = arith.constant dense<0xFF80> : vector<16xbf16>
    %9 = vector.multi_reduction <maximumf>, %3, %cst [1] : vector<16x16xbf16> to vector<16xbf16>
    %10 = vector.shape_cast %9 : vector<16xbf16> to vector<16x1xbf16>
    %cst_5 = arith.constant -1.000000e+00 : bf16
    %11 = vector.broadcast %cst_5 : bf16 to vector<16x1xbf16>
    %12 = arith.cmpf ogt, %10, %11 : vector<16x1xbf16>
    %13 = arith.extui %12 : vector<16x1xi1> to vector<16x1xi32>
    %14 = arith.sitofp %13 : vector<16x1xi32> to vector<16x1xf32>
    %c0_6 = arith.constant 0 : index
    %c0_7 = arith.constant 0 : index
    %15 = vector.load %arg3[%c0_6, %c0_7] : memref<6x1536xbf16, #tpu.memory_space<vmem>>, vector<6x1536xbf16>
    %cst_8 = arith.constant dense<0.000000e+00> : vector<16x1536xf32>
    %16 = tpu.matmul %1, %15, %cst_8 {dimension_numbers = #tpu.dot_dimension_numbers<[1], [0], [0], [1], [0, 0, 1, 1], [], []>} : vector<16x6xbf16>, vector<6x1536xbf16>, vector<16x1536xf32> -> vector<16x1536xf32>
    %c0_9 = arith.constant 0 : index
    %c0_10 = arith.constant 0 : index
    %17 = vector.load %arg4[%c0_9, %c0_10] : memref<1x1536xf32, #tpu.memory_space<vmem>>, vector<1x1536xf32>
    %18 = vector.broadcast %17 : vector<1x1536xf32> to vector<16x1536xf32>
    %19 = arith.addf %16, %18 : vector<16x1536xf32>
    %20 = vector.extract_strided_slice %19 {offsets = [0, 0], sizes = [16, 128], strides = [1, 1]} : vector<16x1536xf32> to vector<16x128xf32>
    %21 = arith.truncf %20 : vector<16x128xf32> to vector<16x128xbf16>
    %22 = vector.extract_strided_slice %19 {offsets = [0, 384], sizes = [16, 128], strides = [1, 1]} : vector<16x1536xf32> to vector<16x128xf32>
    %23 = arith.truncf %22 : vector<16x128xf32> to vector<16x128xbf16>
    %24 = vector.extract_strided_slice %19 {offsets = [0, 768], sizes = [16, 128], strides = [1, 1]} : vector<16x1536xf32> to vector<16x128xf32>
    %25 = arith.truncf %24 : vector<16x128xf32> to vector<16x128xbf16>
    %cst_11 = arith.constant dense<0.000000e+00> : vector<16x16xf32>
    %26 = tpu.matmul %21, %23, %cst_11 {dimension_numbers = #tpu.dot_dimension_numbers<[1], [1], [0], [0], [0, 0, 1, 0], [], []>} : vector<16x128xbf16>, vector<16x128xbf16>, vector<16x16xf32> -> vector<16x16xf32>
    %cst_12 = arith.constant 0.176776692 : f32
    %27 = vector.broadcast %cst_12 : f32 to vector<16x16xf32>
    %28 = arith.mulf %26, %27 : vector<16x16xf32>
    %29 = arith.extf %3 : vector<16x16xbf16> to vector<16x16xf32>
    %30 = arith.addf %28, %29 : vector<16x16xf32>
    %cst_13 = arith.constant dense<0xFF800000> : vector<16xf32>
    %31 = vector.multi_reduction <maximumf>, %30, %cst_13 [1] : vector<16x16xf32> to vector<16xf32>
    %32 = vector.shape_cast %31 : vector<16xf32> to vector<16x1xf32>
    %33 = vector.broadcast %32 : vector<16x1xf32> to vector<16x16xf32>
    %34 = arith.subf %30, %33 : vector<16x16xf32>
    %35 = math.exp %34 : vector<16x16xf32>
    %cst_14 = arith.constant dense<0.000000e+00> : vector<16xf32>
    %36 = vector.multi_reduction <add>, %35, %cst_14 [1] : vector<16x16xf32> to vector<16xf32>
    %37 = vector.shape_cast %36 : vector<16xf32> to vector<16x1xf32>
    %38 = tpu.reciprocal %37 {approx = true} : vector<16x1xf32> -> vector<16x1xf32>
    %39 = vector.broadcast %38 : vector<16x1xf32> to vector<16x16xf32>
    %40 = arith.mulf %35, %39 : vector<16x16xf32>
    %41 = arith.truncf %40 : vector<16x16xf32> to vector<16x16xbf16>
    %cst_15 = arith.constant dense<0.000000e+00> : vector<16x128xf32>
    %42 = tpu.matmul %41, %25, %cst_15 {dimension_numbers = #tpu.dot_dimension_numbers<[1], [0], [0], [1], [0, 0, 1, 1], [], []>} : vector<16x16xbf16>, vector<16x128xbf16>, vector<16x128xf32> -> vector<16x128xf32>
    %43 = vector.broadcast %14 : vector<16x1xf32> to vector<16x128xf32>
    %44 = arith.mulf %42, %43 : vector<16x128xf32>
    %45 = vector.extract_strided_slice %19 {offsets = [0, 1152], sizes = [16, 128], strides = [1, 1]} : vector<16x1536xf32> to vector<16x128xf32>
    %46 = arith.addf %44, %45 : vector<16x128xf32>
    %c0_16 = arith.constant 0 : index
    %c0_17 = arith.constant 0 : index
    %47 = vector.load %arg10[%c0_16, %c0_17] : memref<16x384xf32, #tpu.memory_space<vmem>>, vector<16x128xf32>
    tpu.vector_store %arg10[%c0_16, %c0_17], %46 {strides = array<i32>} : memref<16x384xf32, #tpu.memory_space<vmem>>, vector<16x128xf32>,
    %48 = vector.extract_strided_slice %19 {offsets = [0, 128], sizes = [16, 128], strides = [1, 1]} : vector<16x1536xf32> to vector<16x128xf32>
    %49 = arith.truncf %48 : vector<16x128xf32> to vector<16x128xbf16>
    %50 = vector.extract_strided_slice %19 {offsets = [0, 512], sizes = [16, 128], strides = [1, 1]} : vector<16x1536xf32> to vector<16x128xf32>
    %51 = arith.truncf %50 : vector<16x128xf32> to vector<16x128xbf16>
    %52 = vector.extract_strided_slice %19 {offsets = [0, 896], sizes = [16, 128], strides = [1, 1]} : vector<16x1536xf32> to vector<16x128xf32>
    %53 = arith.truncf %52 : vector<16x128xf32> to vector<16x128xbf16>
    %cst_18 = arith.constant dense<0.000000e+00> : vector<16x16xf32>
    %54 = tpu.matmul %49, %51, %cst_18 {dimension_numbers = #tpu.dot_dimension_numbers<[1], [1], [0], [0], [0, 0, 1, 0], [], []>} : vector<16x128xbf16>, vector<16x128xbf16>, vector<16x16xf32> -> vector<16x16xf32>
    %cst_19 = arith.constant 0.176776692 : f32
    %55 = vector.broadcast %cst_19 : f32 to vector<16x16xf32>
    %56 = arith.mulf %54, %55 : vector<16x16xf32>
    %57 = arith.extf %3 : vector<16x16xbf16> to vector<16x16xf32>
    %58 = arith.addf %56, %57 : vector<16x16xf32>
    %cst_20 = arith.constant dense<0xFF800000> : vector<16xf32>
    %59 = vector.multi_reduction <maximumf>, %58, %cst_20 [1] : vector<16x16xf32> to vector<16xf32>
    %60 = vector.shape_cast %59 : vector<16xf32> to vector<16x1xf32>
    %61 = vector.broadcast %60 : vector<16x1xf32> to vector<16x16xf32>
    %62 = arith.subf %58, %61 : vector<16x16xf32>
    %63 = math.exp %62 : vector<16x16xf32>
    %cst_21 = arith.constant dense<0.000000e+00> : vector<16xf32>
    %64 = vector.multi_reduction <add>, %63, %cst_21 [1] : vector<16x16xf32> to vector<16xf32>
    %65 = vector.shape_cast %64 : vector<16xf32> to vector<16x1xf32>
    %66 = tpu.reciprocal %65 {approx = true} : vector<16x1xf32> -> vector<16x1xf32>
    %67 = vector.broadcast %66 : vector<16x1xf32> to vector<16x16xf32>
    %68 = arith.mulf %63, %67 : vector<16x16xf32>
    %69 = arith.truncf %68 : vector<16x16xf32> to vector<16x16xbf16>
    %cst_22 = arith.constant dense<0.000000e+00> : vector<16x128xf32>
    %70 = tpu.matmul %69, %53, %cst_22 {dimension_numbers = #tpu.dot_dimension_numbers<[1], [0], [0], [1], [0, 0, 1, 1], [], []>} : vector<16x16xbf16>, vector<16x128xbf16>, vector<16x128xf32> -> vector<16x128xf32>
    %71 = vector.broadcast %14 : vector<16x1xf32> to vector<16x128xf32>
    %72 = arith.mulf %70, %71 : vector<16x128xf32>
    %73 = vector.extract_strided_slice %19 {offsets = [0, 1280], sizes = [16, 128], strides = [1, 1]} : vector<16x1536xf32> to vector<16x128xf32>
    %74 = arith.addf %72, %73 : vector<16x128xf32>
    %c0_23 = arith.constant 0 : index
    %c128 = arith.constant 128 : index
    %75 = vector.load %arg10[%c0_23, %c128] : memref<16x384xf32, #tpu.memory_space<vmem>>, vector<16x128xf32>
    tpu.vector_store %arg10[%c0_23, %c128], %74 {strides = array<i32>} : memref<16x384xf32, #tpu.memory_space<vmem>>, vector<16x128xf32>,
    %76 = vector.extract_strided_slice %19 {offsets = [0, 256], sizes = [16, 128], strides = [1, 1]} : vector<16x1536xf32> to vector<16x128xf32>
    %77 = arith.truncf %76 : vector<16x128xf32> to vector<16x128xbf16>
    %78 = vector.extract_strided_slice %19 {offsets = [0, 640], sizes = [16, 128], strides = [1, 1]} : vector<16x1536xf32> to vector<16x128xf32>
    %79 = arith.truncf %78 : vector<16x128xf32> to vector<16x128xbf16>
    %80 = vector.extract_strided_slice %19 {offsets = [0, 1024], sizes = [16, 128], strides = [1, 1]} : vector<16x1536xf32> to vector<16x128xf32>
    %81 = arith.truncf %80 : vector<16x128xf32> to vector<16x128xbf16>
    %cst_24 = arith.constant dense<0.000000e+00> : vector<16x16xf32>
    %82 = tpu.matmul %77, %79, %cst_24 {dimension_numbers = #tpu.dot_dimension_numbers<[1], [1], [0], [0], [0, 0, 1, 0], [], []>} : vector<16x128xbf16>, vector<16x128xbf16>, vector<16x16xf32> -> vector<16x16xf32>
    %cst_25 = arith.constant 0.176776692 : f32
    %83 = vector.broadcast %cst_25 : f32 to vector<16x16xf32>
    %84 = arith.mulf %82, %83 : vector<16x16xf32>
    %85 = arith.extf %3 : vector<16x16xbf16> to vector<16x16xf32>
    %86 = arith.addf %84, %85 : vector<16x16xf32>
    %cst_26 = arith.constant dense<0xFF800000> : vector<16xf32>
    %87 = vector.multi_reduction <maximumf>, %86, %cst_26 [1] : vector<16x16xf32> to vector<16xf32>
    %88 = vector.shape_cast %87 : vector<16xf32> to vector<16x1xf32>
    %89 = vector.broadcast %88 : vector<16x1xf32> to vector<16x16xf32>
    %90 = arith.subf %86, %89 : vector<16x16xf32>
    %91 = math.exp %90 : vector<16x16xf32>
    %cst_27 = arith.constant dense<0.000000e+00> : vector<16xf32>
    %92 = vector.multi_reduction <add>, %91, %cst_27 [1] : vector<16x16xf32> to vector<16xf32>
    %93 = vector.shape_cast %92 : vector<16xf32> to vector<16x1xf32>
    %94 = tpu.reciprocal %93 {approx = true} : vector<16x1xf32> -> vector<16x1xf32>
    %95 = vector.broadcast %94 : vector<16x1xf32> to vector<16x16xf32>
    %96 = arith.mulf %91, %95 : vector<16x16xf32>
    %97 = arith.truncf %96 : vector<16x16xf32> to vector<16x16xbf16>
    %cst_28 = arith.constant dense<0.000000e+00> : vector<16x128xf32>
    %98 = tpu.matmul %97, %81, %cst_28 {dimension_numbers = #tpu.dot_dimension_numbers<[1], [0], [0], [1], [0, 0, 1, 1], [], []>} : vector<16x16xbf16>, vector<16x128xbf16>, vector<16x128xf32> -> vector<16x128xf32>
    %99 = vector.broadcast %14 : vector<16x1xf32> to vector<16x128xf32>
    %100 = arith.mulf %98, %99 : vector<16x128xf32>
    %101 = vector.extract_strided_slice %19 {offsets = [0, 1408], sizes = [16, 128], strides = [1, 1]} : vector<16x1536xf32> to vector<16x128xf32>
    %102 = arith.addf %100, %101 : vector<16x128xf32>
    %c0_29 = arith.constant 0 : index
    %c256 = arith.constant 256 : index
    %103 = vector.load %arg10[%c0_29, %c256] : memref<16x384xf32, #tpu.memory_space<vmem>>, vector<16x128xf32>
    tpu.vector_store %arg10[%c0_29, %c256], %102 {strides = array<i32>} : memref<16x384xf32, #tpu.memory_space<vmem>>, vector<16x128xf32>,
    %c0_30 = arith.constant 0 : index
    %c0_31 = arith.constant 0 : index
    %104 = vector.load %arg10[%c0_30, %c0_31] : memref<16x384xf32, #tpu.memory_space<vmem>>, vector<16x384xf32>
    %105 = vector.broadcast %8 : vector<16x1xf32> to vector<16x384xf32>
    %106 = arith.mulf %104, %105 : vector<16x384xf32>
    %cst_32 = arith.constant dense<0.000000e+00> : vector<384xf32>
    %107 = vector.multi_reduction <add>, %106, %cst_32 [0] : vector<16x384xf32> to vector<384xf32>
    %108 = vector.shape_cast %107 : vector<384xf32> to vector<1x384xf32>
    %cst_33 = arith.constant 6.250000e-02 : f32
    %109 = vector.broadcast %cst_33 : f32 to vector<1x384xf32>
    %110 = arith.mulf %108, %109 : vector<1x384xf32>
    %111 = vector.broadcast %110 : vector<1x384xf32> to vector<16x384xf32>
    %112 = arith.subf %104, %111 : vector<16x384xf32>
    %113 = arith.mulf %112, %112 : vector<16x384xf32>
    %114 = vector.broadcast %8 : vector<16x1xf32> to vector<16x384xf32>
    %115 = arith.mulf %113, %114 : vector<16x384xf32>
    %cst_34 = arith.constant dense<0.000000e+00> : vector<384xf32>
    %116 = vector.multi_reduction <add>, %115, %cst_34 [0] : vector<16x384xf32> to vector<384xf32>
    %117 = vector.shape_cast %116 : vector<384xf32> to vector<1x384xf32>
    %cst_35 = arith.constant 6.250000e-02 : f32
    %118 = vector.broadcast %cst_35 : f32 to vector<1x384xf32>
    %119 = arith.mulf %117, %118 : vector<1x384xf32>
    %cst_36 = arith.constant 9.99999974E-6 : f32
    %120 = vector.broadcast %cst_36 : f32 to vector<1x384xf32>
    %121 = arith.addf %119, %120 : vector<1x384xf32>
    %122 = math.rsqrt %121 : vector<1x384xf32>
    %123 = vector.broadcast %122 : vector<1x384xf32> to vector<16x384xf32>
    %124 = arith.mulf %112, %123 : vector<16x384xf32>
    %c0_37 = arith.constant 0 : index
    %c0_38 = arith.constant 0 : index
    %125 = vector.load %arg5[%c0_37, %c0_38] : memref<1x384xf32, #tpu.memory_space<vmem>>, vector<1x384xf32>
    %126 = vector.broadcast %125 : vector<1x384xf32> to vector<16x384xf32>
    %127 = arith.mulf %124, %126 : vector<16x384xf32>
    %c0_39 = arith.constant 0 : index
    %c0_40 = arith.constant 0 : index
    %128 = vector.load %arg6[%c0_39, %c0_40] : memref<1x384xf32, #tpu.memory_space<vmem>>, vector<1x384xf32>
    %129 = vector.broadcast %128 : vector<1x384xf32> to vector<16x384xf32>
    %130 = arith.addf %127, %129 : vector<16x384xf32>
    %cst_41 = arith.constant 0.000000e+00 : f32
    %131 = vector.broadcast %cst_41 : f32 to vector<16x384xf32>
    %132 = arith.maximumf %130, %131 : vector<16x384xf32>
    %133 = arith.truncf %132 : vector<16x384xf32> to vector<16x384xbf16>
    %c0_42 = arith.constant 0 : index
    %c0_43 = arith.constant 0 : index
    %134 = vector.load %arg7[%c0_42, %c0_43] : memref<384x512xbf16, #tpu.memory_space<vmem>>, vector<384x512xbf16>
    %cst_44 = arith.constant dense<0.000000e+00> : vector<16x512xf32>
    %135 = tpu.matmul %133, %134, %cst_44 {dimension_numbers = #tpu.dot_dimension_numbers<[1], [0], [0], [1], [0, 0, 1, 1], [], []>} : vector<16x384xbf16>, vector<384x512xbf16>, vector<16x512xf32> -> vector<16x512xf32>
    %c0_45 = arith.constant 0 : index
    %c0_46 = arith.constant 0 : index
    %136 = vector.load %arg8[%c0_45, %c0_46] : memref<1x512xf32, #tpu.memory_space<vmem>>, vector<1x512xf32>
    %137 = vector.broadcast %136 : vector<1x512xf32> to vector<16x512xf32>
    %138 = arith.addf %135, %137 : vector<16x512xf32>
    %139 = vector.extract_strided_slice %138 {offsets = [0, 0], sizes = [16, 128], strides = [1, 1]} : vector<16x512xf32> to vector<16x128xf32>
    %140 = arith.truncf %139 : vector<16x128xf32> to vector<16x128xbf16>
    %141 = vector.extract_strided_slice %138 {offsets = [0, 128], sizes = [16, 128], strides = [1, 1]} : vector<16x512xf32> to vector<16x128xf32>
    %142 = arith.truncf %141 : vector<16x128xf32> to vector<16x128xbf16>
    %143 = vector.extract_strided_slice %138 {offsets = [0, 256], sizes = [16, 128], strides = [1, 1]} : vector<16x512xf32> to vector<16x128xf32>
    %144 = arith.truncf %143 : vector<16x128xf32> to vector<16x128xbf16>
    %cst_47 = arith.constant dense<0.000000e+00> : vector<16x16xf32>
    %145 = tpu.matmul %140, %142, %cst_47 {dimension_numbers = #tpu.dot_dimension_numbers<[1], [1], [0], [0], [0, 0, 1, 0], [], []>} : vector<16x128xbf16>, vector<16x128xbf16>, vector<16x16xf32> -> vector<16x16xf32>
    %cst_48 = arith.constant 0.353553385 : f32
    %146 = vector.broadcast %cst_48 : f32 to vector<16x16xf32>
    %147 = arith.mulf %145, %146 : vector<16x16xf32>
    %148 = arith.extf %3 : vector<16x16xbf16> to vector<16x16xf32>
    %149 = arith.addf %147, %148 : vector<16x16xf32>
    %cst_49 = arith.constant dense<0xFF800000> : vector<16xf32>
    %150 = vector.multi_reduction <maximumf>, %149, %cst_49 [1] : vector<16x16xf32> to vector<16xf32>
    %151 = vector.shape_cast %150 : vector<16xf32> to vector<16x1xf32>
    %152 = vector.broadcast %151 : vector<16x1xf32> to vector<16x16xf32>
    %153 = arith.subf %149, %152 : vector<16x16xf32>
    %154 = math.exp %153 : vector<16x16xf32>
    %cst_50 = arith.constant dense<0.000000e+00> : vector<16xf32>
    %155 = vector.multi_reduction <add>, %154, %cst_50 [1] : vector<16x16xf32> to vector<16xf32>
    %156 = vector.shape_cast %155 : vector<16xf32> to vector<16x1xf32>
    %157 = tpu.reciprocal %156 {approx = true} : vector<16x1xf32> -> vector<16x1xf32>
    %158 = vector.broadcast %157 : vector<16x1xf32> to vector<16x16xf32>
    %159 = arith.mulf %154, %158 : vector<16x16xf32>
    %160 = arith.truncf %159 : vector<16x16xf32> to vector<16x16xbf16>
    %cst_51 = arith.constant dense<0.000000e+00> : vector<16x128xf32>
    %161 = tpu.matmul %160, %144, %cst_51 {dimension_numbers = #tpu.dot_dimension_numbers<[1], [0], [0], [1], [0, 0, 1, 1], [], []>} : vector<16x16xbf16>, vector<16x128xbf16>, vector<16x128xf32> -> vector<16x128xf32>
    %162 = vector.broadcast %14 : vector<16x1xf32> to vector<16x128xf32>
    %163 = arith.mulf %161, %162 : vector<16x128xf32>
    %164 = vector.extract_strided_slice %138 {offsets = [0, 384], sizes = [16, 128], strides = [1, 1]} : vector<16x512xf32> to vector<16x128xf32>
    %165 = arith.addf %163, %164 : vector<16x128xf32>
    %c0_52 = arith.constant 0 : index
    %c0_53 = arith.constant 0 : index
    %c0_54 = arith.constant 0 : index
    %166 = vector.load %arg9[%c0_52, %c0_53, %c0_54] : memref<1x16x128xf32, #tpu.memory_space<vmem>>, vector<1x16x128xf32>
    %167 = vector.shape_cast %166 : vector<1x16x128xf32> to vector<16x128xf32>
    %168 = vector.shape_cast %165 : vector<16x128xf32> to vector<1x16x128xf32>
    tpu.vector_store %arg9[%c0_52, %c0_53, %c0_54], %168 {strides = array<i32>} : memref<1x16x128xf32, #tpu.memory_space<vmem>>, vector<1x16x128xf32>,
    return
  }
  func.func @transform_0(%arg0: i32) -> (i32, i32, i32) {
    %c0_i32 = arith.constant 0 : i32
    %c0_i32_0 = arith.constant 0 : i32
    %c0_i32_1 = arith.constant 0 : i32
    return %arg0, %c0_i32, %c0_i32_0 : i32, i32, i32
  }
  func.func @transform_1(%arg0: i32) -> (i32, i32, i32) {
    %c0_i32 = arith.constant 0 : i32
    %c0_i32_0 = arith.constant 0 : i32
    %c0_i32_1 = arith.constant 0 : i32
    return %arg0, %c0_i32, %c0_i32_0 : i32, i32, i32
  }
  func.func @transform_2(%arg0: i32) -> (i32, i32) {
    %c0_i32 = arith.constant 0 : i32
    %c0_i32_0 = arith.constant 0 : i32
    %c0_i32_1 = arith.constant 0 : i32
    return %c0_i32, %c0_i32_0 : i32, i32
  }
  func.func @transform_3(%arg0: i32) -> (i32, i32) {
    %c0_i32 = arith.constant 0 : i32
    %c0_i32_0 = arith.constant 0 : i32
    %c0_i32_1 = arith.constant 0 : i32
    return %c0_i32, %c0_i32_0 : i32, i32
  }
  func.func @transform_4(%arg0: i32) -> (i32, i32) {
    %c0_i32 = arith.constant 0 : i32
    %c0_i32_0 = arith.constant 0 : i32
    %c0_i32_1 = arith.constant 0 : i32
    return %c0_i32, %c0_i32_0 : i32, i32
  }
  func.func @transform_5(%arg0: i32) -> (i32, i32) {
    %c0_i32 = arith.constant 0 : i32
    %c0_i32_0 = arith.constant 0 : i32
    %c0_i32_1 = arith.constant 0 : i32
    return %c0_i32, %c0_i32_0 : i32, i32
  }
  func.func @transform_6(%arg0: i32) -> (i32, i32) {
    %c0_i32 = arith.constant 0 : i32
    %c0_i32_0 = arith.constant 0 : i32
    %c0_i32_1 = arith.constant 0 : i32
    return %c0_i32, %c0_i32_0 : i32, i32
  }
  func.func @transform_7(%arg0: i32) -> (i32, i32) {
    %c0_i32 = arith.constant 0 : i32
    %c0_i32_0 = arith.constant 0 : i32
    %c0_i32_1 = arith.constant 0 : i32
    return %c0_i32, %c0_i32_0 : i32, i32
  }
  func.func @transform_8(%arg0: i32) -> (i32, i32, i32) {
    %c0_i32 = arith.constant 0 : i32
    %c0_i32_0 = arith.constant 0 : i32
    %c0_i32_1 = arith.constant 0 : i32
    return %arg0, %c0_i32, %c0_i32_0 : i32, i32, i32
  }
}

</mosaic_0001>

<bundles_post_ra>
// kernel: tpu_custom_call.1
= control target key start
LH: loop header
LB: loop body
LE: loop exit
PB: predicated region body
PF: predicated region fallthrough
CT: control target
= control target key end

     0   :  { %s3290_s0 = inlined_call_operand.vmem [shape: bf16[4,16,6], index: 0, kind: input, shape index: {}]   ;;  %s3291_s1 = inlined_call_operand.vmem [shape: bf16[4,16,16], index: 1, kind: input, shape index: {}]   ;;  %s3292_s2 = inlined_call_operand.hbm [shape: bf16[6,1536], index: 2, kind: input, shape index: {}]   ;;  %s3293_s3 = inlined_call_operand.vmem [shape: f32[1,1536], index: 3, kind: input, shape index: {}]   ;;  %s3294_s4 = inlined_call_operand.hbm [shape: f32[1,384], index: 4, kind: input, shape index: {}]   ;;  %s3295_s5 = inlined_call_operand.hbm [shape: f32[1,384], index: 5, kind: input, shape index: {}]   ;;  %s3296_s6 = inlined_call_operand.hbm [shape: bf16[384,512], index: 6, kind: input, shape index: {}]   ;;  %s3297_s7 = inlined_call_operand.vmem [shape: f32[1,512], index: 7, kind: input, shape index: {}]   ;;  %s3298_s8 = inlined_call_operand.hbm [shape: f32[4,16,128], index: 8, kind: output, shape index: {}]  }
   0x1   :  { %3299 = sst [smem:[#allocation16_spill]] %s3292_s2 }
   0x2   :  { %3300 = sst [smem:[#allocation17_spill]] %s3294_s4 }
   0x3   :  { %3301 = sst [smem:[#allocation18_spill]] %s3295_s5 }
   0x4   :  { %13 = vsyncpa [#allocation4], 0 }
   0x5   :  { %14 = vsyncpa [#allocation7], 0 }
   0x6   :  { %15 = vsyncpa [#allocation10], 0 }
   0x7   :  { %16 = vsyncpa [#allocation5], 0 }
   0x8   :  { %18 = vsyncpa [#allocation5 + $0x1], 0  ;;  %s2908_s27 = smov 0   ;;  %s2910_s28 = smov 0  }
   0x9   :  { %s2912_s29 = smov 0   ;;  %s2914_s30 = smov 0  }
   0xa LB: > { %s2929_s9 = sadd.s32 4294967295, %s2852_s30   ;;  %s2003_s10 = sadd.s32 4294967294, %s2852_s30   ;;  %s2852_s30 = sphi %s2914_s30, %s3312_s30   ;;  %s2848_s29 = sphi %s2912_s29, %s3311_s29   ;;  %s2844_s28 = sphi %s2910_s28, %s3310_s28   ;;  %s2840_s27 = sphi %s2908_s27, %s3309_s27  }
   0xb   : > { %s2933_s11 = sadd.s32 1, %s2852_s30   ;;  %s209_s12 = sadd.s32 1, %s2848_s29 }
   0xc   : > { %s206_s13 = ssub.s32 %s2852_s30, %s2933_s11  ;;  %p219_p0 = scmp.ne.s32.totalorder %s2848_s29, %s2844_s28 }
   0xd   : > { %p207_p1 = scmp.eq.s32.totalorder %s206_s13, 0  ;;  %p220_p2 = scmp.eq.s32.totalorder %s2929_s9, 3 }
   0xe   : > { %p225_p3 = scmp.ne.s32.totalorder %s2844_s28, %s2840_s27  ;;  %p226_p4 = scmp.eq.s32.totalorder %s2003_s10, 3 }
   0xf   : > { %s2944_s14 = scalar_select %p207_p1, %s2848_s29, %s209_s12  }
  0x10   : > { %p2946_p5 = por %p220_p2, %p219_p0  ;;  %p2950_p6 = por %p226_p4, %p225_p3 }
  0x11   : > { %p2004_p7 = scmp.ge.s32.totalorder %s2852_s30, 1  ;;  %p233_p8 = scmp.lt.s32.totalorder %s2852_s30, 5 }
  0x12   : > { %p2570_p9 = scmp.eq.s32.totalorder %s2929_s9, 0  ;;  %s3305_s4 = sld [smem:[#allocation17_spill]] }
  0x13   : > { %p2957_p10 = pnand %p2004_p7, %p233_p8  ;;  %s2854_s21 = smov [#allocation6]  }
  0x14   : > { %s262_s22 = sshll.u32 %s2854_s21, 4  ;;  %s3306_s2 = sld [smem:[#allocation16_spill]]  ;;  %s263_s22 = int_to_ptr.vmem [resolvable:$true] %s262_s22 }
  0x15   : > { %p2553_p11 = pneg %p2957_p10  ;;  %s3308_s5 = sld [smem:[#allocation18_spill]] }
  0x16   : > { %s2855_s18 = smov [#allocation3]   ;;  %s283_s24 = sshll.u32 %s3296_s6, 4  ;;  %s284_s24 = int_to_ptr.hbm [resolvable:$true] %s283_s24 }
  0x17   : > { %p2971_p12 = pnand %p2570_p9, %p2553_p11  ;;  %s247_s19 = sshll.u32 %s2855_s18, 4  ;;  %s248_s19 = int_to_ptr.vmem [resolvable:$true] %s247_s19 }
  0x18   : > { %s260_s20 = sshll.u32 %s3305_s4, 4  ;;  %s2857_s10 = smov [#allocation9]   ;;  %s261_s20 = int_to_ptr.hbm [resolvable:$true] %s260_s20 }
  0x19   : > { %2559 = dma.hbm_to_vmem [thread:$0]  (!%p2971_p12), %s261_s20, 48, %s263_s22, [#allocation7]  }
  0x1a   : > { %s245_s25 = sshll.u32 %s3306_s2, 4  ;;  %s2856_s2 = smov [#allocation8]   ;;  %s246_s25 = int_to_ptr.hbm [resolvable:$true] %s245_s25 }
  0x1b   : > { %s272_s13 = sshll.u32 %s3308_s5, 4  ;;  %s274_s4 = sshll.u32 %s2856_s2, 4  ;;  %s273_s13 = int_to_ptr.hbm [resolvable:$true] %s272_s13  ;;  %s275_s4 = int_to_ptr.vmem [resolvable:$true] %s274_s4 }
  0x1c   : > { %2556 = dma.hbm_to_vmem [thread:$0]  (!%p2971_p12), %s246_s25, 768, %s248_s19, [#allocation4]  }
  0x1d   : > { %2562 = dma.hbm_to_vmem [thread:$0]  (!%p2971_p12), %s273_s13, 48, %s275_s4, [#allocation7]  }
  0x1e   : > { %s285_s12 = sshll.u32 %s2857_s10, 4  ;;  %s2858_s18 = smov 256   ;;  %s286_s12 = int_to_ptr.vmem [resolvable:$true] %s285_s12 }
  0x1f   : > { %s2859_s5 = smov 16   ;;  %320 = sbr.rel (%p2957_p10) target bundleno = 1537 (0x601), region = 52 }
  0x20   : > { %2565 = dma.hbm_to_vmem [thread:$0]  (!%p2971_p12), %s284_s24, 12288, %s286_s12, [#allocation10], %s2858_s18, %s2858_s18, %s2859_s5  }
  0x24   : > { %2823 = dma.done.wait (%p2570_p9), [#allocation4], 768  }
  0x25   : > { %2825 = vsyncadd (%p2570_p9), [#allocation4], 4294966528 }
  0x26   : > { %2827 = dma.done.wait (%p2570_p9), [#allocation7], 96  }
  0x27   : > { %2829 = vsyncadd (%p2570_p9), [#allocation7], 4294967200 }
  0x28   : > { %2831 = dma.done.wait (%p2570_p9), [#allocation10], 12288  }
  0x29   : > { %2833 = vsyncadd (%p2570_p9), [#allocation10], 4294955008  ;;  %p375_p13 = scmp.lt.s32.totalorder %s2929_s9, 3  ;;  %v418_v0 = vld [vmem:[#allocation3] sm:$0x77]  ;;  %vm491_vm0 = vcmask 1042432  }
  0x2a   : > { %v419_v1 = vld [vmem:[#allocation3 + $0x8] sm:$0x77]  ;;  %v463_v2 = vunpack.c.l.b16 %v418_v0  ;;  %v464_v4 = vunpack.c.h.b16 %v418_v0  ;;  %v420_v5 = vld [vmem:[#allocation3 + $0x10] sm:$0x77]  ;;  %v3008_v7 = vld [vmem:[#allocation3 + $0x18] sm:$0x77] }
  0x2b   : > { %s3005_s2 = scalar_select %p375_p13, %s2929_s9, 3  ;;  %v466_v3 = vunpack.c.h.b16 %v419_v1  ;;  %v465_v6 = vunpack.c.l.b16 %v419_v1  ;;  %v467_v8 = vunpack.c.l.b16 %v420_v5  ;;  %v468_v9 = vunpack.c.h.b16 %v420_v5  ;;  %v3039_v26 = vld [vmem:[#allocation3 + $0x20] sm:$0x77]  ;;  %v3042_v28 = vld [vmem:[#allocation3 + $0x28] sm:$0x77] }
  0x2c   : > { %v469_v10 = vunpack.c.l.b16 %v3008_v7  ;;  %v475_v11 = vpack.c.b16 %v463_v2, %v463_v2  ;;  %v476_v13 = vpack.c.b16 %v464_v4, %v464_v4  ;;  %vm487_vm1 = vcmask 48128   ;;  %v3054_v37 = vld [vmem:[%s3293_s3] sm:$0xff]  ;;  %s372_s12 = sand.u32 1, %s2844_s28  }
  0x2d   : > { %s2431_s4 = sshll.u32 %s3005_s2, 3  ;;  %v478_v12 = vpack.c.b16 %v466_v3, %v466_v3  ;;  %v477_v14 = vpack.c.b16 %v465_v6, %v465_v6  ;;  %v479_v15 = vpack.c.b16 %v467_v8, %v467_v8  ;;  %v480_v16 = vpack.c.b16 %v468_v9, %v468_v9  ;;  %s2015_s18 = sshll.u32 %s372_s12, 4 }
  0x2e   : > { %s379_s20 = scalar_lea.vmem %s3290_s0, %s2431_s4  ;;  %v481_v17 = vpack.c.b16 %v469_v10, %v469_v10  ;;  %v493_v18 = vsel %vm491_vm0, %v475_v11, 0  ;;  %v496_v21 = vsel %vm491_vm0, %v476_v13, 0  ;;  %v471_v27 = vunpack.c.l.b16 %v3039_v26  ;;  %s384_s23 = scalar_lea.vmem %s3291_s1, %s2431_s4 }
  0x2f   : > { %v502_v19 = vsel %vm491_vm0, %v478_v12, 0  ;;  %v3018_v20 = vld [vmem:[%s379_s20] sm:$0xff]  ;;  %v499_v22 = vsel %vm491_vm0, %v477_v14, 0  ;;  %535 = vmatpush.bf16.msra.mxu0 %v493_v18  ;;  %v505_v23 = vsel %vm491_vm0, %v479_v15, 0  ;;  %v508_v24 = vsel %vm491_vm0, %v480_v16, 0  ;;  %549 = vmatpush.bf16.msra.mxu1 %v496_v21  ;;  %s2530_s2 = sshll.u32 %s2929_s9, 4 }
  0x30   : > { %577 = vmatpush.bf16.msra.mxu3 %v502_v19  ;;  %v511_v25 = vsel %vm491_vm0, %v481_v17, 0  ;;  %563 = vmatpush.bf16.msra.mxu2 %v499_v22  ;;  %v483_v29 = vpack.c.b16 %v471_v27, %v471_v27  ;;  %v473_v30 = vunpack.c.l.b16 %v3042_v28  ;;  %v431_v39 = vperm.slane %v3054_v37, 3  ;;  %v3070_v18 = vld [vmem:[%s3293_s3 + $0x8] sm:$0xf]  ;;  %s1884_s17 = scalar_lea.hbm %s3298_s8, %s2530_s2  ;;  %s374_s20 = scalar_lea.vmem [#allocation11], %s2015_s18 }
  0x31   : > { %v428_v47 = vperm.slane %v3054_v37, 0  ;;  %v433_v49 = vperm.slane %v3054_v37, 5  ;;  %v432_v50 = vperm.slane %v3054_v37, 4  ;;  %v429_v59 = vperm.slane %v3054_v37, 1  ;;  %s1885_s22 = sshll.u32 %s374_s20, 4  ;;  %s1887_s25 = sshll.u32 %s1884_s17, 4  ;;  %s1886_s22 = int_to_ptr.vmem [resolvable:$true] %s1885_s22  ;;  %s1888_s25 = int_to_ptr.hbm [resolvable:$true] %s1887_s25 }
  0x32   : > { %2026 = vmatmul.msk.bf16.vlgmr.msra.gmra.mxu0 %vm487_vm1, %v3018_v20  ;;  %2027 = vmatmul.msk.bf16.vlgmr.msra.gmra.mxu1 %vm487_vm1, %v3018_v20  ;;  %v517_v31 = vsel %vm491_vm0, %v483_v29, 0  ;;  %v485_v32 = vpack.c.b16 %v473_v30, %v473_v30  ;;  %v430_v1 = vperm.slane %v3054_v37, 2  ;;  %v434_v9 = vperm.slane %v3054_v37, 6  ;;  %s1873_s9 = scalar_lea.sflag [#allocation5], %s372_s12  ;;  %s2792_s26 = sshra.s32 %s1888_s25, 4  ;;  %s2793_s26 = int_to_ptr.hbm [resolvable:$true] %s2792_s26 }
  0x33   : > { %591 = vmatpush.bf16.msrb.mxu0 %v505_v23  ;;  %605 = vmatpush.bf16.msrb.mxu1 %v508_v24  ;;  %v472_v13 = vunpack.c.h.b16 %v3039_v26  ;;  %v436_v19 = vperm.slane %v3070_v18, 0  ;;  %vm401_vm2 = vcmask 130048   ;;  %s2794_s13 = scalar_lea.hbm %s2793_s26, 16  ;;  %p2799_p3 = scmp.lt.s32.totalorder %s2793_s26, %s3298_s8 }
  0x34   : > { %2029 = vmatmul.msk.bf16.vlgmr.msra.gmra.mxu3 %vm487_vm1, %v3018_v20  ;;  %619 = vmatpush.bf16.msrb.mxu2 %v511_v25  ;;  %v523_v33 = vsel %vm491_vm0, %v485_v32, 0  ;;  %v2532_v25 = vld [vmem:[%s384_s23] sm:$0xff]   ;;  %p2795_p0 = scmp.ne.s32.totalorder %s2793_s26, %s2794_s13  ;;  %s2798_s23 = scalar_lea.hbm %s3298_s8, 64 }
  0x35   : > { %2028 = vmatmul.msk.bf16.vlgmr.msra.gmra.mxu2 %vm487_vm1, %v3018_v20  ;;  %v484_v15 = vpack.c.b16 %v472_v13, %v472_v13  ;;  %v3080_v27 = vunpack.c.l.bf16 %v2532_v25  ;;  %p2800_p4 = scmp.lt.s32.totalorder %s2798_s23, %s2794_s13 }
  0x36   : > { %p2796_p1 = pnand %p2795_p0, %p2946_p5 }
  0x37   : > { %647 = vmatpush.bf16.msra.mxu0 %v517_v31  ;;  %v520_v16 = vsel %vm491_vm0, %v484_v15, 0  ;;  %p2801_p7 = por %p2800_p4, %p2799_p3 }
  0x38   : > { %675 = vmatpush.bf16.msra.mxu2 %v523_v33  ;;  %661 = vmatpush.bf16.msra.mxu1 %v520_v16  ;;  %v3084_v33 = vunpack.c.h.bf16 %v2532_v25  ;;  %p2797_p2 = pneg %p2796_p1 }
  0x3a   : > { %p2802_p8 = pnand %p2801_p7, %p2797_p2 }
  0x42   : > { %2030 = vmatmul.msk.bf16.vlgmr.msrb.gmra.mxu0 %vm487_vm1, %v3018_v20  ;;  %2031 = vmatmul.msk.bf16.vlgmr.msrb.gmra.mxu1 %vm487_vm1, %v3018_v20 }
  0x45   : > { %2032 = vmatmul.msk.bf16.vlgmr.msrb.gmra.mxu2 %vm487_vm1, %v3018_v20 }
  0x52   : > { %2034 = vmatmul.msk.bf16.vlgmr.msra.gmra.mxu0 %vm487_vm1, %v3018_v20  ;;  %2035 = vmatmul.msk.bf16.vlgmr.msra.gmra.mxu1 %vm487_vm1, %v3018_v20 }
  0x55   : > { %2036 = vmatmul.msk.bf16.vlgmr.msra.gmra.mxu2 %vm487_vm1, %v3018_v20 }
  0xaf   : > { %v537_v34 = vpop.f32.mrf.mxu0  ;;  %v551_v35 = vpop.f32.mrf.mxu1 }
  0xb0   : > { %v538_v52 = vadd.f32 %v537_v34, %v428_v47  ;;  %v552_v63 = vadd.f32 %v551_v35, %v429_v59 }
  0xb7   : > { %v579_v36 = vpop.f32.mrf.mxu3  ;;  %v539_v38 = vpop.f32.mrf.mxu0 }
  0xb8   : > { %v553_v40 = vpop.f32.mrf.mxu1  ;;  %v580_v41 = vadd.f32 %v579_v36, %v431_v39  ;;  %v540_v48 = vadd.f32 %v539_v38, %v428_v47  ;;  %v565_v51 = vpop.f32.mrf.mxu2 }
  0xb9   : > { %v554_v0 = vadd.f32 %v553_v40, %v429_v59  ;;  %v566_v4 = vadd.f32 %v565_v51, %v430_v1 }
  0xba   : > { %v696_v53 = vpack.c.bf16 %v540_v48, %v538_v52 }
  0xbb   : > { %v763_v3 = vpack.c.bf16 %v554_v0, %v552_v63 }
  0xbf   : > { %v581_v42 = vpop.f32.mrf.mxu3  ;;  %v593_v44 = vpop.f32.mrf.mxu0 }
  0xc0   : > { %v582_v43 = vadd.f32 %v581_v42, %v431_v39  ;;  %v607_v46 = vpop.f32.mrf.mxu1  ;;  %v594_v56 = vadd.f32 %v593_v44, %v432_v50  ;;  %v567_v2 = vpop.f32.mrf.mxu2 }
  0xc1   : > { %v608_v54 = vadd.f32 %v607_v46, %v433_v49  ;;  %v568_v5 = vadd.f32 %v567_v2, %v430_v1 }
  0xc2   : > { %v697_v45 = vpack.c.bf16 %v582_v43, %v580_v41 }
  0xc3   : > { %v830_v6 = vpack.c.bf16 %v568_v5, %v566_v4 }
  0xc4   : > { %706 = vmatpush.bf16.xpose.msrb.mxu0 %v697_v45 }
  0xc7   : > { %v595_v55 = vpop.f32.mrf.mxu0 }
  0xc8   : > { %v596_v57 = vadd.f32 %v595_v55, %v432_v50  ;;  %v609_v58 = vpop.f32.mrf.mxu1  ;;  %v621_v8 = vpop.f32.mrf.mxu2 }
  0xc9   : > { %v610_v60 = vadd.f32 %v609_v58, %v433_v49  ;;  %v622_v11 = vadd.f32 %v621_v8, %v434_v9 }
  0xca   : > { %v764_v61 = vpack.c.bf16 %v596_v57, %v594_v56  ;;  %v470_v56 = vunpack.c.h.b16 %v3008_v7 }
  0xcb   : > { %707 = vmatmul.bf16.vlgmr.msrb.gmra.mxu0 %v696_v53  ;;  %v831_v62 = vpack.c.bf16 %v610_v60, %v608_v54 }
  0xcc   : > { %773 = vmatpush.bf16.xpose.msrb.mxu2 %v764_v61  ;;  %v482_v57 = vpack.c.b16 %v470_v56, %v470_v56 }
  0xcd   : > { %840 = vmatpush.bf16.xpose.msra.mxu0 %v831_v62 }
  0xce   : > { %v514_v58 = vsel %vm491_vm0, %v482_v57, 0 }
  0xcf   : > { %v649_v17 = vpop.f32.mrf.mxu0  ;;  %633 = vmatpush.bf16.msrb.mxu3 %v514_v58 }
  0xd0   : > { %v623_v10 = vpop.f32.mrf.mxu2  ;;  %v650_v21 = vadd.f32 %v649_v17, %v436_v19 }
  0xd1   : > { %v624_v12 = vadd.f32 %v623_v10, %v434_v9 }
  0xd2   : > { %2033 = vmatmul.msk.bf16.vlgmr.msrb.gmra.mxu3 %vm487_vm1, %v3018_v20 }
  0xd3   : > { %774 = vmatmul.bf16.vlgmr.msrb.gmra.mxu2 %v763_v3  ;;  %v698_v14 = vpack.c.bf16 %v624_v12, %v622_v11 }
  0xd5   : > { %750 = vmatpush.bf16.msrb.mxu1 %v698_v14 }
  0xd7   : > { %v651_v22 = vpop.f32.mrf.mxu0 }
  0xd8   : > { %v652_v23 = vadd.f32 %v651_v22, %v436_v19  ;;  %v3078_v26 = vpop.f32.mrf.mxu2 }
  0xda   : > { %v832_v24 = vpack.c.bf16 %v652_v23, %v650_v21 }
  0xdb   : > { %841 = vmatmul.bf16.vlgmr.msra.gmra.mxu0 %v830_v6 }
  0xdc   : > { %884 = vmatpush.bf16.msra.mxu1 %v832_v24 }
  0xe0   : > { %v3086_v34 = vpop.f32.mrf.mxu2 }
 0x148   : > { %v708_v29 = vpop.f32.mrf.mxu0 }
 0x149   : > { %v713_v30 = vmul.f32 0.17677669, %v708_v29 }
 0x14b   : > { %v715_v31 = vadd.f32 %v3080_v27, %v713_v30  ;;  %v474_v30 = vunpack.c.h.b16 %v3042_v28  ;;  %v405_v28 = vsel %vm401_vm2, %v3084_v33, -inf }
 0x14d   : > { %v717_v32 = vsel %vm401_vm2, %v715_v31, -inf }
 0x14e   : > { %718 = vmax.xlane.f32.xlu1 %v717_v32 }
 0x150   : > { %v710_v35 = vpop.f32.mrf.mxu0 }
 0x151   : > { %v714_v36 = vmul.f32 0.17677669, %v710_v35 }
 0x153   : > { %v716_v38 = vadd.f32 %v3084_v33, %v714_v36  ;;  %v435_v36 = vperm.slane %v3054_v37, 7 }
 0x155   : > { %v720_v39 = vsel %vm401_vm2, %v716_v38, -inf  ;;  %v635_v35 = vpop.f32.mrf.mxu3 }
 0x156   : > { %721 = vmax.xlane.f32.xlu1 %v720_v39  ;;  %v775_v40 = vpop.f32.mrf.mxu2 }
 0x157   : > { %v780_v42 = vmul.f32 0.17677669, %v775_v40 }
 0x158   : > { %v842_v41 = vpop.f32.mrf.mxu0 }
 0x159   : > { %v847_v43 = vmul.f32 0.17677669, %v842_v41  ;;  %v782_v44 = vadd.f32 %v3080_v27, %v780_v42  ;;  %v402_v42 = vsel %vm401_vm2, %v3080_v27, -inf }
 0x15b   : > { %v849_v45 = vadd.f32 %v3080_v27, %v847_v43  ;;  %v784_v46 = vsel %vm401_vm2, %v782_v44, -inf }
 0x15c   : > { %785 = vmax.xlane.f32.xlu0 %v784_v46 }
 0x15d   : > { %v851_v47 = vsel %vm401_vm2, %v849_v45, -inf  ;;  %v637_v39 = vpop.f32.mrf.mxu3 }
 0x15e   : > { %852 = vmax.xlane.f32.xlu2 %v851_v47  ;;  %v777_v48 = vpop.f32.mrf.mxu2  ;;  %v638_v40 = vadd.f32 %v637_v39, %v435_v36 }
 0x15f   : > { %v781_v50 = vmul.f32 0.17677669, %v777_v48 }
 0x160   : > { %v844_v49 = vpop.f32.mrf.mxu0 }
 0x161   : > { %v848_v51 = vmul.f32 0.17677669, %v844_v49  ;;  %v783_v52 = vadd.f32 %v3084_v33, %v781_v50 }
 0x163   : > { %v850_v53 = vadd.f32 %v3084_v33, %v848_v51  ;;  %v787_v54 = vsel %vm401_vm2, %v783_v52, -inf }
 0x164   : > { %788 = vmax.xlane.f32.xlu0 %v787_v54 }
 0x165   : > { %v854_v55 = vsel %vm401_vm2, %v850_v53, -inf }
 0x166   : > { %855 = vmax.xlane.f32.xlu2 %v854_v55 }
 0x1c1   : > { %v719_v59 = vpop.xlane.xlu1 %718 }
 0x1c2   : > { %v723_v60 = vsub.f32 %v715_v31, %v719_v59  ;;  %v486_v31 = vpack.c.b16 %v474_v30, %v474_v30 }
 0x1c4   : > { %v725_v61 = vmul.f32 1.442695, %v723_v60  ;;  %v526_v32 = vsel %vm491_vm0, %v486_v31, 0  ;;  %v2125_v31 = vld [vmem:[#allocation9 + $0xb0] sm:$0xf0] }
 0x1c5   : > { %689 = vmatpush.bf16.msra.mxu3 %v526_v32 }
 0x1c6   : > { %2620 = vpow2.f32 %v725_v61 }
 0x1c8   : > { %2037 = vmatmul.msk.bf16.vlgmr.msra.gmra.mxu3 %vm487_vm1, %v3018_v20 }
 0x1c9   : > { %v722_v0 = vpop.xlane.xlu1 %721 }
 0x1ca   : > { %v724_v3 = vsub.f32 %v716_v38, %v722_v0  ;;  %v636_v38 = vadd.f32 %v635_v35, %v435_v36  ;;  %v2267_v35 = vld [vmem:[#allocation9 + $0x1c0] sm:$0xf]  ;;  %v2492_v36 = vld [vmem:[#allocation9 + $0x1cc] sm:$0xf0] }
 0x1cc   : > { %v3102_v62 = vpop.eup %2620  ;;  %v727_v5 = vmul.f32 1.442695, %v724_v3  ;;  %v765_v41 = vpack.c.bf16 %v638_v40, %v636_v38  ;;  %v2268_v40 = vor.u32 %v2492_v36, %v2267_v35  ;;  %v2061_v35 = vld [vmem:[#allocation9 + $0x30] sm:$0xf0] }
 0x1cd   : > { %v729_v63 = vsel %vm401_vm2, %v3102_v62, 0.0 }
 0x1ce   : > { %730 = vadd.xlane.f32.xlu2 %v729_v63  ;;  %817 = vmatpush.bf16.msrb.mxu3 %v765_v41  ;;  %v2107_v41 = vld [vmem:[#allocation9 + $0x80] sm:$0xf] }
 0x1cf   : > { %v786_v1 = vpop.xlane.xlu0 %785 }
 0x1d0   : > { %v790_v2 = vsub.f32 %v782_v44, %v786_v1  ;;  %v2155_v1 = vld [vmem:[#allocation9 + $0xe0] sm:$0xf] }
 0x1d1   : > { %v853_v7 = vpop.xlane.xlu2 %852 }
 0x1d2   : > { %v792_v4 = vmul.f32 1.442695, %v790_v2  ;;  %v857_v12 = vsub.f32 %v849_v45, %v853_v7  ;;  %v2464_v7 = vld [vmem:[#allocation9 + $0xec] sm:$0xf0]  ;;  %v2462_v2 = vld [vmem:[#allocation9 + $0xe4] sm:$0xf] }
 0x1d4   : > { %2622 = vpow2.f32 %v792_v4  ;;  %v859_v16 = vmul.f32 1.442695, %v857_v12  ;;  %v2156_v4 = vor.u32 %v2464_v7, %v2155_v1  ;;  %v2460_v12 = vld [vmem:[#allocation9 + $0xcc] sm:$0xf0] }
 0x1d5   : > { %2624 = vpow2.f32 %v727_v5  ;;  %v2157_v5 = vld [vmem:[#allocation9 + $0xf0] sm:$0xf0] }
 0x1d6   : > { %1637 = vmatpush.bf16.msra.mxu2 %v2156_v4 }
 0x1d7   : > { %v789_v6 = vpop.xlane.xlu0 %788 }
 0x1d8   : > { %v791_v9 = vsub.f32 %v783_v52, %v789_v6  ;;  %v2160_v6 = vor.u32 %v2462_v2, %v2157_v5 }
 0x1d9   : > { %v856_v8 = vpop.xlane.xlu2 %855 }
 0x1da   : > { %v858_v10 = vsub.f32 %v850_v53, %v856_v8  ;;  %v2623_v11 = vpop.eup %2622  ;;  %v794_v13 = vmul.f32 1.442695, %v791_v9 }
 0x1db   : > { %v796_v15 = vsel %vm401_vm2, %v2623_v11, 0.0  ;;  %v2625_v17 = vpop.eup %2624 }
 0x1dc   : > { %v861_v14 = vmul.f32 1.442695, %v858_v10  ;;  %2626 = vpow2.f32 %v794_v13  ;;  %797 = vadd.xlane.f32.xlu0 %v796_v15  ;;  %v732_v23 = vsel %vm401_vm2, %v2625_v17, 0.0  ;;  %v2458_v13 = vld [vmem:[#allocation9 + $0xc4] sm:$0xf] }
 0x1dd   : > { %v2141_v15 = vld [vmem:[#allocation9 + $0xd0] sm:$0xf0] }
 0x1de   : > { %2628 = vpow2.f32 %v861_v14 }
 0x1df   : > { %2630 = vpow2.f32 %v859_v16  ;;  %v2144_v16 = vor.u32 %v2458_v13, %v2141_v15  ;;  %v2442_v13 = vld [vmem:[#allocation9 + $0x44] sm:$0xf] }
 0x1e2   : > { %v2627_v19 = vpop.eup %2626 }
 0x1e3   : > { %v799_v22 = vsel %vm401_vm2, %v2627_v19, 0.0 }
 0x1e4   : > { %v2629_v21 = vpop.eup %2628  ;;  %800 = vadd.xlane.f32.xlu1 %v799_v22  ;;  %733 = vadd.xlane.f32.xlu0 %v732_v23 }
 0x1e5   : > { %v866_v24 = vsel %vm401_vm2, %v2629_v21, 0.0  ;;  %v2631_v25 = vpop.eup %2630 }
 0x1e6   : > { %867 = vadd.xlane.f32.xlu2 %v866_v24  ;;  %v863_v29 = vsel %vm401_vm2, %v2631_v25, 0.0  ;;  %v2123_v24 = vld [vmem:[#allocation9 + $0xa0] sm:$0xf] }
 0x1ec   : > { %864 = vadd.xlane.f32.xlu1 %v863_v29  ;;  %403 = vmax.xlane.f32.xlu0 %v402_v42  ;;  %v2454_v29 = vld [vmem:[#allocation9 + $0xa4] sm:$0xf]  ;;  %v2452_v42 = vld [vmem:[#allocation9 + $0x8c] sm:$0xf0] }
 0x1ed   : > { %v2128_v32 = vor.u32 %v2454_v29, %v2125_v31  ;;  %v2379_v29 = vld [vmem:[#allocation9 + $0x2a0] sm:$0xf]  ;;  %v2520_v31 = vld [vmem:[#allocation9 + $0x2ac] sm:$0xf0] }
 0x1f4   : > { %406 = vmax.xlane.f32.xlu1 %v405_v28  ;;  %v2450_v28 = vld [vmem:[#allocation9 + $0x84] sm:$0xf] }
 0x241   : > { %v731_v44 = vpop.xlane.xlu2 %730 }
 0x242   : > { %2632 = vrcp.f32 %v731_v44  ;;  %v2109_v44 = vld [vmem:[#allocation9 + $0x90] sm:$0xf0] }
 0x248   : > { %v2633_v37 = vpop.eup %2632 }
 0x249   : > { %v737_v48 = vmul.f32 %v2633_v37, %v3102_v62  ;;  %v3124_v62 = vpop.f32.mrf.mxu1  ;;  %v2488_v37 = vld [vmem:[#allocation9 + $0x1ac] sm:$0xf0] }
 0x24b   : > { %v3126_v3 = vpop.f32.mrf.mxu3 }
 0x24f   : > { %v798_v43 = vpop.xlane.xlu0 %797 }
 0x250   : > { %2634 = vrcp.f32 %v798_v43  ;;  %v2108_v43 = vor.u32 %v2452_v42, %v2107_v41  ;;  %v2203_v42 = vld [vmem:[#allocation9 + $0x140] sm:$0xf] }
 0x251   : > { %v3128_v8 = vpop.f32.mrf.mxu1 }
 0x253   : > { %v3130_v38 = vpop.f32.mrf.mxu3 }
 0x256   : > { %v2635_v46 = vpop.eup %2634 }
 0x257   : > { %v734_v20 = vpop.xlane.xlu0 %733  ;;  %v801_v45 = vpop.xlane.xlu1 %800  ;;  %v804_v51 = vmul.f32 %v2635_v46, %v2623_v11  ;;  %v2139_v11 = vld [vmem:[#allocation9 + $0xc0] sm:$0xf]  ;;  %v437_v46 = vperm.slane %v3070_v18, 1 }
 0x258   : > { %2636 = vrcp.f32 %v734_v20  ;;  %v2140_v14 = vor.u32 %v2460_v12, %v2139_v11  ;;  %v2112_v20 = vor.u32 %v2450_v28, %v2109_v44  ;;  %v2524_v12 = vld [vmem:[#allocation9 + $0x2cc] sm:$0xf0]  ;;  %v439_v44 = vperm.slane %v3070_v18, 3 }
 0x259   : > { %2638 = vrcp.f32 %v801_v45  ;;  %v868_v55 = vpop.xlane.xlu2 %867  ;;  %v2251_v45 = vld [vmem:[#allocation9 + $0x1a0] sm:$0xf]  ;;  %v664_v2 = vadd.f32 %v3124_v62, %v437_v46  ;;  %v666_v4 = vadd.f32 %v3128_v8, %v437_v46  ;;  %v2480_v8 = vld [vmem:[#allocation9 + $0x16c] sm:$0xf0] }
 0x25a   : > { %1638 = vmatpush.bf16.msra.mxu2 %v2140_v14  ;;  %v2077_v14 = vld [vmem:[#allocation9 + $0x50] sm:$0xf0]  ;;  %v2476_v28 = vld [vmem:[#allocation9 + $0x14c] sm:$0xf0] }
 0x25b   : > { %v2080_v62 = vor.u32 %v2442_v13, %v2077_v14  ;;  %v2490_v14 = vld [vmem:[#allocation9 + $0x1c4] sm:$0xf] }
 0x25e   : > { %v2637_v47 = vpop.eup %2636 }
 0x25f   : > { %v738_v49 = vmul.f32 %v2637_v47, %v2625_v17  ;;  %v2639_v50 = vpop.eup %2638  ;;  %v865_v54 = vpop.xlane.xlu1 %864  ;;  %v2283_v17 = vld [vmem:[#allocation9 + $0x1e0] sm:$0xf]  ;;  %v2860_v47 = vmov 0.0  }
 0x260   : > { %v805_v53 = vmul.f32 %v2639_v50, %v2627_v19  ;;  %2640 = vrcp.f32 %v865_v54  ;;  %v404_v63 = vpop.xlane.xlu0 %403  ;;  %v2496_v19 = vld [vmem:[#allocation9 + $0x1ec] sm:$0xf0]  ;;  %v2252_v50 = vor.u32 %v2488_v37, %v2251_v45  ;;  %v2204_v37 = vor.u32 %v2476_v28, %v2203_v42  ;;  %v2331_v42 = vld [vmem:[#allocation9 + $0x240] sm:$0xf] }
 0x261   : > { %v739_v52 = vpack.c.bf16 %v738_v49, %v737_v48  ;;  %2642 = vrcp.f32 %v868_v55  ;;  %v408_v9 = vpack.c.bf16 %v404_v63, %v404_v63  ;;  %v2284_v23 = vor.u32 %v2496_v19, %v2283_v17  ;;  %v2528_v55 = vld [vmem:[#allocation9 + $0x2ec] sm:$0xf0]  ;;  %v2219_v19 = vld [vmem:[#allocation9 + $0x160] sm:$0xf] }
 0x262   : > { %v806_v56 = vpack.c.bf16 %v805_v53, %v804_v51  ;;  %v2091_v51 = vld [vmem:[#allocation9 + $0x60] sm:$0xf]  ;;  %v2484_v63 = vld [vmem:[#allocation9 + $0x18c] sm:$0xf0] }
 0x263   : > { %2038 = vmatmul.msk.bf16.vlgmr.msrb.gmra.mxu1 %vm401_vm2, %v739_v52  ;;  %1651 = vmatpush.bf16.msra.mxu3 %v2284_v23  ;;  %v2448_v52 = vld [vmem:[#allocation9 + $0x6c] sm:$0xf0]  ;;  %v2411_v53 = vld [vmem:[#allocation9 + $0x2e0] sm:$0xf] }
 0x264   : > { %2039 = vmatmul.msk.bf16.vlgmr.msrb.gmra.mxu3 %vm401_vm2, %v806_v56  ;;  %1679 = vmatpush.bf16.msrb.mxu1 %v2160_v6  ;;  %v2092_v54 = vor.u32 %v2448_v52, %v2091_v51  ;;  %v2446_v56 = vld [vmem:[#allocation9 + $0x64] sm:$0xf]  ;;  %v2075_v6 = vld [vmem:[#allocation9 + $0x40] sm:$0xf]  ;;  %v2436_v52 = vld [vmem:[#allocation9 + $0xc] sm:$0xf0] }
 0x265   : > { %v2043_v51 = vld [vmem:[#allocation9] sm:$0xf]  ;;  %v2508_v28 = vld [vmem:[#allocation9 + $0x24c] sm:$0xf0] }
 0x266   : > { %v2641_v57 = vpop.eup %2640 }
 0x267   : > { %v2643_v58 = vpop.eup %2642  ;;  %v871_v59 = vmul.f32 %v2641_v57, %v2631_v25  ;;  %v407_v0 = vpop.xlane.xlu1 %406  ;;  %v2456_v25 = vld [vmem:[#allocation9 + $0xac] sm:$0xf0]  ;;  %1652 = vmatpush.bf16.msra.mxu3 %v2268_v40  ;;  %v2093_v57 = vld [vmem:[#allocation9 + $0x70] sm:$0xf0]  ;;  %v2380_v40 = vor.u32 %v2520_v31, %v2379_v29 }
 0x268   : > { %v872_v60 = vmul.f32 %v2643_v58, %v2629_v21  ;;  %v409_v10 = vpack.c.bf16 %v407_v0, %v407_v0  ;;  %v410_v21 = vunpack.c.l.bf16 %v408_v9  ;;  %1680 = vmatpush.bf16.msrb.mxu1 %v2144_v16  ;;  %v2124_v30 = vor.u32 %v2456_v25, %v2123_v24  ;;  %v2444_v9 = vld [vmem:[#allocation9 + $0x4c] sm:$0xf0]  ;;  %v2059_v24 = vld [vmem:[#allocation9 + $0x20] sm:$0xf] }
 0x269   : > { %v2076_v11 = vor.u32 %v2444_v9, %v2075_v6  ;;  %v2440_v25 = vld [vmem:[#allocation9 + $0x2c] sm:$0xf0]  ;;  %v2347_v9 = vld [vmem:[#allocation9 + $0x260] sm:$0xf] }
 0x26a   : > { %v873_v61 = vpack.c.bf16 %v872_v60, %v871_v59  ;;  %v411_v22 = vunpack.c.l.bf16 %v409_v10  ;;  %vm412_vm3 = vcmp.gt.f32.partialorder %v410_v21, -1.0  ;;  %1639 = vmatpush.bf16.msra.mxu2 %v2124_v30  ;;  %v2412_v59 = vor.u32 %v2528_v55, %v2411_v53  ;;  %v2395_v10 = vld [vmem:[#allocation9 + $0x2c0] sm:$0xf]  ;;  %v2516_v55 = vld [vmem:[#allocation9 + $0x28c] sm:$0xf0] }
 0x26b   : > { %v3134_v48 = vsel %vm412_vm3, 1.0, %v2860_v47  ;;  %1653 = vmatpush.bf16.msra.mxu3 %v2252_v50  ;;  %v2096_v60 = vor.u32 %v2446_v56, %v2093_v57  ;;  %v2396_v17 = vor.u32 %v2524_v12, %v2395_v10  ;;  %v438_v21 = vperm.slane %v3070_v18, 2  ;;  %v2363_v53 = vld [vmem:[#allocation9 + $0x280] sm:$0xf]  ;;  %v2045_v56 = vld [vmem:[#allocation9 + $0x10] sm:$0xf0] }
 0x26c   : > { %vm413_vm4 = vcmp.gt.f32.partialorder %v411_v22, -1.0  ;;  %1681 = vmatpush.bf16.msrb.mxu1 %v2128_v32  ;;  %1665 = vmatpush.bf16.msrb.mxu0 %v2412_v59  ;;  %v2220_v22 = vor.u32 %v2480_v8, %v2219_v19  ;;  %v2060_v30 = vor.u32 %v2440_v25, %v2059_v24  ;;  %v2438_v32 = vld [vmem:[#allocation9 + $0x24] sm:$0xf]  ;;  %v2364_v59 = vor.u32 %v2516_v55, %v2363_v53  ;;  %v2472_v6 = vld [vmem:[#allocation9 + $0x12c] sm:$0xf0] }
 0x26d   : > { %v3137_v49 = vsel %vm413_vm4, 1.0, %v2860_v47  ;;  %v2064_v41 = vor.u32 %v2438_v32, %v2061_v35  ;;  %v680_v46 = vadd.f32 %v3086_v34, %v438_v21  ;;  %v2494_v34 = vld [vmem:[#allocation9 + $0x1e4] sm:$0xf]  ;;  %v2512_v10 = vld [vmem:[#allocation9 + $0x26c] sm:$0xf0]  ;;  %v692_v24 = vadd.f32 %v3126_v3, %v439_v44 }
 0x26e   : > { %1640 = vmatpush.bf16.msra.mxu2 %v2108_v43  ;;  %v678_v43 = vadd.f32 %v3078_v26, %v438_v21  ;;  %v2434_v26 = vld [vmem:[#allocation9 + $0x4] sm:$0xf]  ;;  %v2348_v13 = vor.u32 %v2512_v10, %v2347_v9  ;;  %v694_v25 = vadd.f32 %v3130_v38, %v439_v44  ;;  %v2468_v31 = vld [vmem:[#allocation9 + $0x10c] sm:$0xf0]  ;;  %v2413_v35 = vld [vmem:[#allocation9 + $0x2f0] sm:$0xf0] }
 0x26f   : > { %v2526_v32 = vld [vmem:[#allocation9 + $0x2e4] sm:$0xf]  ;;  %v2253_v44 = vld [vmem:[#allocation9 + $0x1b0] sm:$0xf0] }
 0x270   : > { %1682 = vmatpush.bf16.msrb.mxu1 %v2112_v20  ;;  %1666 = vmatpush.bf16.msrb.mxu0 %v2396_v17  ;;  %v2269_v17 = vld [vmem:[#allocation9 + $0x1d0] sm:$0xf0]  ;;  %v2416_v3 = vor.u32 %v2526_v32, %v2413_v35  ;;  %v2486_v38 = vld [vmem:[#allocation9 + $0x1a4] sm:$0xf]  ;;  %v2227_v32 = vld [vmem:[#allocation9 + $0x168] sm:$0xf] }
 0x271   : > { %v2272_v21 = vor.u32 %v2490_v14, %v2269_v17  ;;  %v2522_v53 = vld [vmem:[#allocation9 + $0x2c4] sm:$0xf]  ;;  %v2381_v10 = vld [vmem:[#allocation9 + $0x2b0] sm:$0xf0]  ;;  %v2299_v17 = vld [vmem:[#allocation9 + $0x200] sm:$0xf] }
 0x272   : > { %1641 = vmatpush.bf16.msra.mxu2 %v2092_v54  ;;  %v2044_v54 = vor.u32 %v2436_v52, %v2043_v51  ;;  %v2489_v51 = vld [vmem:[#allocation9 + $0x1b4] sm:$0xf0]  ;;  %v2518_v9 = vld [vmem:[#allocation9 + $0x2a4] sm:$0xf] }
 0x273   : > { %2040 = vmatmul.msk.bf16.vlgmr.msra.gmra.mxu1 %vm401_vm2, %v873_v61  ;;  %v2235_v61 = vld [vmem:[#allocation9 + $0x180] sm:$0xf]  ;;  %v2384_v14 = vor.u32 %v2518_v9, %v2381_v10  ;;  %v2481_v35 = vld [vmem:[#allocation9 + $0x174] sm:$0xf0]  ;;  %v2195_v9 = vld [vmem:[#allocation9 + $0x128] sm:$0xf] }
 0x274   : > { %v2236_v7 = vor.u32 %v2484_v63, %v2235_v61  ;;  %1683 = vmatpush.bf16.msrb.mxu1 %v2096_v60  ;;  %1667 = vmatpush.bf16.msrb.mxu0 %v2380_v40  ;;  %v2285_v60 = vld [vmem:[#allocation9 + $0x1f0] sm:$0xf0]  ;;  %v2048_v61 = vor.u32 %v2434_v26, %v2045_v56  ;;  %v2473_v10 = vld [vmem:[#allocation9 + $0x134] sm:$0xf0] }
 0x275   : > { %v2288_v63 = vor.u32 %v2494_v34, %v2285_v60  ;;  %v2504_v34 = vld [vmem:[#allocation9 + $0x22c] sm:$0xf0] }
 0x276   : > { %1654 = vmatpush.bf16.msra.mxu3 %v2236_v7  ;;  %1642 = vmatpush.bf16.msra.mxu2 %v2076_v11  ;;  %v2187_v7 = vld [vmem:[#allocation9 + $0x120] sm:$0xf] }
 0x277   : > { %v2188_v12 = vor.u32 %v2472_v6, %v2187_v7 }
 0x278   : > { %1684 = vmatpush.bf16.msrb.mxu1 %v2080_v62  ;;  %1668 = vmatpush.bf16.msrb.mxu0 %v2364_v59  ;;  %v2275_v62 = vld [vmem:[#allocation9 + $0x1c8] sm:$0xf]  ;;  %v2315_v59 = vld [vmem:[#allocation9 + $0x220] sm:$0xf] }
 0x27a   : > { %1655 = vmatpush.bf16.msra.mxu3 %v2220_v22  ;;  %1643 = vmatpush.bf16.msra.mxu2 %v2060_v30  ;;  %v2493_v22 = vld [vmem:[#allocation9 + $0x1d4] sm:$0xf0] }
 0x27b   : > { %v2276_v30 = vor.u32 %v2493_v22, %v2275_v62  ;;  %v2500_v62 = vld [vmem:[#allocation9 + $0x20c] sm:$0xf0]  ;;  %v2163_v22 = vld [vmem:[#allocation9 + $0xe8] sm:$0xf] }
 0x27c   : > { %1685 = vmatpush.bf16.msrb.mxu1 %v2064_v41  ;;  %1669 = vmatpush.bf16.msrb.mxu0 %v2348_v13 }
 0x27e   : > { %1656 = vmatpush.bf16.msra.mxu3 %v2204_v37  ;;  %1644 = vmatpush.bf16.msra.mxu2 %v2044_v54  ;;  %v2397_v54 = vld [vmem:[#allocation9 + $0x2d0] sm:$0xf0] }
 0x27f   : > { %v2400_v60 = vor.u32 %v2522_v53, %v2397_v54  ;;  %v2211_v53 = vld [vmem:[#allocation9 + $0x148] sm:$0xf]  ;;  %v2477_v54 = vld [vmem:[#allocation9 + $0x154] sm:$0xf0] }
 0x280   : > { %1686 = vmatpush.bf16.msrb.mxu1 %v2048_v61  ;;  %v2316_v61 = vor.u32 %v2504_v34, %v2315_v59 }
 0x282   : > { %1693 = vmatpush.bf16.msrb.mxu2 %v2288_v63  ;;  %1657 = vmatpush.bf16.msra.mxu3 %v2188_v12  ;;  %v2482_v63 = vld [vmem:[#allocation9 + $0x184] sm:$0xf] }
 0x286   : > { %1694 = vmatpush.bf16.msrb.mxu2 %v2272_v21  ;;  %v2221_v21 = vld [vmem:[#allocation9 + $0x170] sm:$0xf0] }
 0x2e0   : > { %v752_v39 = vpop.f32.mrf.mxu1 }
 0x2e1   : > { %v757_v58 = vmul.f32 %v3134_v48, %v752_v39 }
 0x2e3   : > { %v3143_v15 = vadd.f32 %v757_v58, %v664_v2 }
 0x2e7   : > { %v819_v0 = vpop.f32.mrf.mxu3 }
 0x2e8   : > { %v754_v1 = vpop.f32.mrf.mxu1  ;;  %v824_v36 = vmul.f32 %v3134_v48, %v819_v0  ;;  %v2291_v0 = vld [vmem:[#allocation9 + $0x1e8] sm:$0xf] }
 0x2e9   : > { %v758_v5 = vmul.f32 %v3137_v49, %v754_v1  ;;  %v2497_v1 = vld [vmem:[#allocation9 + $0x1f4] sm:$0xf0] }
 0x2ea   : > { %v3155_v18 = vadd.f32 %v824_v36, %v678_v43 }
 0x2eb   : > { %v3145_v16 = vadd.f32 %v758_v5, %v666_v4  ;;  %v2292_v5 = vor.u32 %v2497_v1, %v2291_v0  ;;  %v2237_v0 = vld [vmem:[#allocation9 + $0x190] sm:$0xf0]  ;;  %v2243_v1 = vld [vmem:[#allocation9 + $0x188] sm:$0xf] }
 0x2ed   : > { %v909_v23 = vadd.f32 %v3145_v16, %v3143_v15  ;;  %1735 = vmatpush.bf16.msra.mxu1 %v2292_v5  ;;  %v2240_v5 = vor.u32 %v2482_v63, %v2237_v0  ;;  %v2470_v0 = vld [vmem:[#allocation9 + $0x124] sm:$0xf] }
 0x2ef   : > { %v910_v39 = vrot.slane %v909_v23, 4  ;;  %v821_v20 = vpop.f32.mrf.mxu3 }
 0x2f0   : > { %v886_v45 = vpop.f32.mrf.mxu1  ;;  %v825_v50 = vmul.f32 %v3137_v49, %v821_v20  ;;  %v2332_v20 = vor.u32 %v2508_v28, %v2331_v42  ;;  %v2365_v28 = vld [vmem:[#allocation9 + $0x290] sm:$0xf0] }
 0x2f1   : > { %v911_v47 = vadd.f32 %v910_v39, %v909_v23  ;;  %v891_v11 = vmul.f32 %v3134_v48, %v886_v45  ;;  %v2171_v23 = vld [vmem:[#allocation9 + $0x100] sm:$0xf]  ;;  %v2259_v45 = vld [vmem:[#allocation9 + $0x1a8] sm:$0xf]  ;;  %1736 = vmatpush.bf16.msra.mxu1 %v2276_v30  ;;  %v2465_v30 = vld [vmem:[#allocation9 + $0xf4] sm:$0xf0] }
 0x2f2   : > { %v3157_v58 = vadd.f32 %v825_v50, %v680_v46  ;;  %v2172_v41 = vor.u32 %v2468_v31, %v2171_v23  ;;  %v2256_v50 = vor.u32 %v2486_v38, %v2253_v44  ;;  %v2260_v52 = vor.u32 %v2489_v51, %v2259_v45  ;;  %1670 = vmatpush.bf16.msrb.mxu0 %v2332_v20  ;;  %v2474_v38 = vld [vmem:[#allocation9 + $0x144] sm:$0xf]  ;;  %v2205_v44 = vld [vmem:[#allocation9 + $0x150] sm:$0xf0] }
 0x2f3   : > { %v912_v57 = vrot.slane %v911_v47, 2  ;;  %v3165_v43 = vadd.f32 %v891_v11, %v692_v24  ;;  %v2164_v31 = vor.u32 %v2465_v30, %v2163_v22  ;;  %v2208_v51 = vor.u32 %v2474_v38, %v2205_v44  ;;  %v2173_v22 = vld [vmem:[#allocation9 + $0x110] sm:$0xf0]  ;;  %v2115_v30 = vld [vmem:[#allocation9 + $0x88] sm:$0xf] }
 0x2f4   : > { %v916_v4 = vadd.f32 %v3157_v58, %v3155_v18  ;;  %1658 = vmatpush.bf16.msra.mxu3 %v2172_v41  ;;  %1695 = vmatpush.bf16.msrb.mxu2 %v2256_v50  ;;  %v2461_v50 = vld [vmem:[#allocation9 + $0xd4] sm:$0xf0]  ;;  %v2099_v44 = vld [vmem:[#allocation9 + $0x68] sm:$0xf] }
 0x2f5   : > { %v913_v2 = vadd.f32 %v912_v57, %v911_v47  ;;  %1737 = vmatpush.bf16.msra.mxu1 %v2260_v52 }
 0x2f6   : > { %v917_v8 = vrot.slane %v916_v4, 4  ;;  %1671 = vmatpush.bf16.msrb.mxu0 %v2316_v61  ;;  %v2349_v61 = vld [vmem:[#allocation9 + $0x270] sm:$0xf0] }
 0x2f7   : > { %v914_v19 = vrot.slane %v913_v2, 1 }
 0x2f8   : > { %v888_v29 = vpop.f32.mrf.mxu1  ;;  %v918_v39 = vadd.f32 %v917_v8, %v916_v4  ;;  %1707 = vmatpush.bf16.msrb.mxu3 %v2416_v3  ;;  %v2485_v4 = vld [vmem:[#allocation9 + $0x194] sm:$0xf0]  ;;  %1696 = vmatpush.bf16.msrb.mxu2 %v2240_v5  ;;  %v2478_v8 = vld [vmem:[#allocation9 + $0x164] sm:$0xf]  ;;  %v2228_v3 = vor.u32 %v2481_v35, %v2227_v32  ;;  %v2179_v32 = vld [vmem:[#allocation9 + $0x108] sm:$0xf] }
 0x2f9   : > { %v915_v36 = vadd.f32 %v914_v19, %v913_v2  ;;  %v892_v40 = vmul.f32 %v3137_v49, %v888_v29  ;;  %v2244_v6 = vor.u32 %v2485_v4, %v2243_v1  ;;  %v2300_v19 = vor.u32 %v2500_v62, %v2299_v17  ;;  %v2189_v1 = vld [vmem:[#allocation9 + $0x130] sm:$0xf0]  ;;  %v2457_v5 = vld [vmem:[#allocation9 + $0xb4] sm:$0xf0] }
 0x2fa   : > { %v919_v46 = vrot.slane %v918_v39, 2  ;;  %v2224_v29 = vor.u32 %v2478_v8, %v2221_v21  ;;  %v2192_v4 = vor.u32 %v2470_v0, %v2189_v1  ;;  %v2333_v17 = vld [vmem:[#allocation9 + $0x250] sm:$0xf0]  ;;  %v2466_v21 = vld [vmem:[#allocation9 + $0x104] sm:$0xf] }
 0x2fb   : > { %v930_v37 = vmul.f32 0.0625, %v915_v36  ;;  %v3167_v47 = vadd.f32 %v892_v40, %v694_v25  ;;  %1738 = vmatpush.bf16.msra.mxu1 %v2244_v6  ;;  %v2514_v36 = vld [vmem:[#allocation9 + $0x284] sm:$0xf]  ;;  %1672 = vmatpush.bf16.msrb.mxu0 %v2300_v19  ;;  %v2196_v19 = vor.u32 %v2473_v10, %v2195_v9  ;;  %v2469_v35 = vld [vmem:[#allocation9 + $0x114] sm:$0xf0] }
 0x2fc   : > { %v920_v56 = vadd.f32 %v919_v46, %v918_v39  ;;  %1708 = vmatpush.bf16.msrb.mxu3 %v2400_v60  ;;  %1697 = vmatpush.bf16.msrb.mxu2 %v2224_v29  ;;  %v2368_v20 = vor.u32 %v2514_v36, %v2365_v28  ;;  %v2212_v60 = vor.u32 %v2477_v54, %v2211_v53  ;;  %v2067_v1 = vld [vmem:[#allocation9 + $0x28] sm:$0xf]  ;;  %v2437_v9 = vld [vmem:[#allocation9 + $0x14] sm:$0xf0] }
 0x2fd   : > { %v3170_v55 = vsub.f32 %v3143_v15, %v930_v37  ;;  %v3173_v26 = vsub.f32 %v3145_v16, %v930_v37  ;;  %v923_v57 = vadd.f32 %v3167_v47, %v3165_v43  ;;  %v2176_v29 = vor.u32 %v2466_v21, %v2173_v22  ;;  %v3205_v22 = vld [vmem:[#allocation8] sm:$0x7] }
 0x2fe   : > { %v921_v7 = vrot.slane %v920_v56, 1 }
 0x2ff   : > { %v939_v15 = vmul.f32 %v3170_v55, %v3170_v55  ;;  %v942_v16 = vmul.f32 %v3173_v26, %v3173_v26  ;;  %v924_v2 = vrot.slane %v923_v57, 4  ;;  %1721 = vmatpush.bf16.msra.mxu0 %v2164_v31  ;;  %1739 = vmatpush.bf16.msra.mxu1 %v2228_v3  ;;  %v2502_v3 = vld [vmem:[#allocation9 + $0x224] sm:$0xf] }
 0x300   : > { %v922_v12 = vadd.f32 %v921_v7, %v920_v56  ;;  %1709 = vmatpush.bf16.msrb.mxu3 %v2384_v14  ;;  %v2510_v56 = vld [vmem:[#allocation9 + $0x264] sm:$0xf]  ;;  %1698 = vmatpush.bf16.msrb.mxu2 %v2208_v51 }
 0x301   : > { %v951_v11 = vadd.f32 %v942_v16, %v939_v15  ;;  %v925_v13 = vadd.f32 %v924_v2, %v923_v57  ;;  %v2352_v63 = vor.u32 %v2510_v56, %v2349_v61  ;;  %v2131_v15 = vld [vmem:[#allocation9 + $0xa8] sm:$0xf] }
 0x302   : > { %v931_v24 = vmul.f32 0.0625, %v922_v12  ;;  %v2132_v6 = vor.u32 %v2457_v5, %v2131_v15  ;;  %v2083_v56 = vld [vmem:[#allocation9 + $0x48] sm:$0xf]  ;;  %v2441_v15 = vld [vmem:[#allocation9 + $0x34] sm:$0xf0] }
 0x303   : > { %v952_v23 = vrot.slane %v951_v11, 4  ;;  %v926_v25 = vrot.slane %v925_v13, 2  ;;  %1740 = vmatpush.bf16.msra.mxu1 %v2212_v60 }
 0x304   : > { %v3182_v40 = vsub.f32 %v3155_v18, %v931_v24  ;;  %v3185_v41 = vsub.f32 %v3157_v58, %v931_v24  ;;  %v2147_v58 = vld [vmem:[#allocation9 + $0xc8] sm:$0xf]  ;;  %1710 = vmatpush.bf16.msrb.mxu3 %v2368_v20  ;;  %1699 = vmatpush.bf16.msrb.mxu2 %v2192_v4  ;;  %v2317_v20 = vld [vmem:[#allocation9 + $0x230] sm:$0xf0] }
 0x305   : > { %v953_v39 = vadd.f32 %v952_v23, %v951_v11  ;;  %v927_v42 = vadd.f32 %v926_v25, %v925_v13  ;;  %v2148_v52 = vor.u32 %v2461_v50, %v2147_v58  ;;  %v2506_v11 = vld [vmem:[#allocation9 + $0x244] sm:$0xf] }
 0x306   : > { %v940_v37 = vmul.f32 %v3182_v40, %v3182_v40  ;;  %v943_v18 = vmul.f32 %v3185_v41, %v3185_v41  ;;  %v2336_v8 = vor.u32 %v2506_v11, %v2333_v17  ;;  %v2498_v50 = vld [vmem:[#allocation9 + $0x204] sm:$0xf]  ;;  %v3201_v11 = vld [vmem:[#allocation6] sm:$0x7] }
 0x307   : > { %v954_v45 = vrot.slane %v953_v39, 2  ;;  %v928_v46 = vrot.slane %v927_v42, 1  ;;  %1722 = vmatpush.bf16.msra.mxu0 %v2148_v52  ;;  %1741 = vmatpush.bf16.msra.mxu1 %v2196_v19  ;;  %v2301_v52 = vld [vmem:[#allocation9 + $0x210] sm:$0xf0] }
 0x308   : > { %v958_v59 = vadd.f32 %v943_v18, %v940_v37  ;;  %1711 = vmatpush.bf16.msrb.mxu3 %v2352_v63  ;;  %1700 = vmatpush.bf16.msrb.mxu2 %v2176_v29  ;;  %v2320_v18 = vor.u32 %v2502_v3, %v2317_v20  ;;  %v2304_v54 = vor.u32 %v2498_v50, %v2301_v52  ;;  %v2527_v3 = vld [vmem:[#allocation9 + $0x2ec] sm:$0xf]  ;;  %v2421_v20 = vld [vmem:[#allocation9 + $0x2f8] sm:$0xf0]  ;;  %v2403_v50 = vld [vmem:[#allocation9 + $0x2c8] sm:$0xf] }
 0x309   : > { %v955_v57 = vadd.f32 %v954_v45, %v953_v39  ;;  %v929_v34 = vadd.f32 %v928_v46, %v927_v42  ;;  %v2180_v42 = vor.u32 %v2469_v35, %v2179_v32  ;;  %v2449_v45 = vld [vmem:[#allocation9 + $0x74] sm:$0xf0] }
 0x30a   : > { %v959_v7 = vrot.slane %v958_v59, 4  ;;  %v2100_v46 = vor.u32 %v2449_v45, %v2099_v44 }
 0x30b   : > { %v956_v16 = vrot.slane %v955_v57, 1  ;;  %v932_v2 = vmul.f32 0.0625, %v929_v34  ;;  %1723 = vmatpush.bf16.msra.mxu0 %v2132_v6  ;;  %1742 = vmatpush.bf16.msra.mxu1 %v2180_v42  ;;  %v2051_v6 = vld [vmem:[#allocation9 + $0x8] sm:$0xf] }
 0x30c   : > { %v960_v13 = vadd.f32 %v959_v7, %v958_v59  ;;  %1712 = vmatpush.bf16.msrb.mxu3 %v2336_v8  ;;  %v2445_v59 = vld [vmem:[#allocation9 + $0x54] sm:$0xf0] }
 0x30d   : > { %v957_v12 = vadd.f32 %v956_v16, %v955_v57  ;;  %v3192_v14 = vsub.f32 %v3165_v43, %v932_v2  ;;  %v3195_v62 = vsub.f32 %v3167_v47, %v932_v2  ;;  %v2453_v43 = vld [vmem:[#allocation9 + $0x94] sm:$0xf0]  ;;  %v2084_v61 = vor.u32 %v2445_v59, %v2083_v56  ;;  %v2523_v59 = vld [vmem:[#allocation9 + $0x2cc] sm:$0xf] }
 0x30e   : > { %v961_v24 = vrot.slane %v960_v13, 2  ;;  %v2116_v47 = vor.u32 %v2453_v43, %v2115_v30  ;;  %v2068_v2 = vor.u32 %v2441_v15, %v2067_v1  ;;  %v1030_v43 = vperm.slane %v3205_v22, 0  ;;  %v2165_v15 = vld [vmem:[#allocation9 + $0xf8] sm:$0xf0] }
 0x30f   : > { %v972_v23 = vmul.f32 0.0625, %v957_v12  ;;  %v941_v25 = vmul.f32 %v3192_v14, %v3192_v14  ;;  %v944_v31 = vmul.f32 %v3195_v62, %v3195_v62 }
 0x310   : > { %v962_v39 = vadd.f32 %v961_v24, %v960_v13  ;;  %1724 = vmatpush.bf16.msra.mxu0 %v2116_v47  ;;  %1713 = vmatpush.bf16.msrb.mxu3 %v2320_v18  ;;  %v2052_v13 = vor.u32 %v2437_v9, %v2051_v6  ;;  %v2389_v6 = vld [vmem:[#allocation9 + $0x2b8] sm:$0xf0] }
 0x311   : > { %v975_v36 = vadd.f32 1e-05, %v972_v23  ;;  %v965_v28 = vadd.f32 %v944_v31, %v941_v25  ;;  %v1016_v23 = vperm.slane %v3201_v11, 0 }
 0x312   : > { %v963_v38 = vrot.slane %v962_v39, 1 }
 0x313   : > { %2644 = vrsqrt.f32 %v975_v36  ;;  %v966_v37 = vrot.slane %v965_v28, 4  ;;  %vm984_vm6 = vweird.f32 %v975_v36 }
 0x314   : > { %v964_v58 = vadd.f32 %v963_v38, %v962_v39  ;;  %1725 = vmatpush.bf16.msra.mxu0 %v2100_v46  ;;  %1714 = vmatpush.bf16.msrb.mxu3 %v2304_v54 }
 0x315   : > { %v967_v51 = vadd.f32 %v966_v37, %v965_v28  ;;  %v2529_v28 = vld [vmem:[#allocation9 + $0x2f4] sm:$0xf0] }
 0x316   : > { %v973_v53 = vmul.f32 0.0625, %v964_v58  ;;  %v2424_v58 = vor.u32 %v2527_v3, %v2421_v20  ;;  %v2455_v3 = vld [vmem:[#allocation9 + $0xac] sm:$0xf]  ;;  %v2133_v20 = vld [vmem:[#allocation9 + $0xb8] sm:$0xf0] }
 0x317   : > { %v968_v57 = vrot.slane %v967_v51, 2 }
 0x318   : > { %v976_v60 = vadd.f32 1e-05, %v973_v53  ;;  %1726 = vmatpush.bf16.msra.mxu0 %v2084_v61 }
 0x319   : > { %v2645_v34 = vpop.eup %2644  ;;  %v969_v0 = vadd.f32 %v968_v57, %v967_v51  ;;  %v1031_v51 = vperm.slane %v3205_v22, 1  ;;  %v2525_v57 = vld [vmem:[#allocation9 + $0x2d4] sm:$0xf0] }
 0x31a   : > { %v979_v63 = vmul.f32 %v2645_v34, %v975_v36  ;;  %2646 = vrsqrt.f32 %v976_v60  ;;  %vm985_vm5 = vweird.f32 %v2645_v34  ;;  %v2419_v36 = vld [vmem:[#allocation9 + $0x2e8] sm:$0xf]  ;;  %vm994_vm9 = vweird.f32 %v976_v60 }
 0x31b   : > { %v970_v7 = vrot.slane %v969_v0, 1  ;;  %vm986_vm7 = vmor %vm984_vm6, %vm985_vm5  ;;  %v2420_v46 = vor.u32 %v2529_v28, %v2419_v36 }
 0x31c   : > { %v980_v16 = vmul.f32 %v2645_v34, %v979_v63  ;;  %1727 = vmatpush.bf16.msra.mxu0 %v2068_v2  ;;  %v2387_v2 = vld [vmem:[#allocation9 + $0x2a8] sm:$0xf] }
 0x31d   : > { %v971_v5 = vadd.f32 %v970_v7, %v969_v0  ;;  %v2404_v0 = vor.u32 %v2525_v57, %v2403_v50 }
 0x31e   : > { %v981_v4 = vmul.f32 0.5, %v980_v16 }
 0x31f   : > { %v974_v12 = vmul.f32 0.0625, %v971_v5  ;;  %v2519_v5 = vld [vmem:[#allocation9 + $0x2ac] sm:$0xf] }
 0x320   : > { %v982_v10 = vsub.f32 1.5, %v981_v4  ;;  %v2647_v17 = vpop.eup %2646  ;;  %1728 = vmatpush.bf16.msra.mxu0 %v2052_v13  ;;  %v2521_v4 = vld [vmem:[#allocation9 + $0x2b4] sm:$0xf0]  ;;  %v1018_v13 = vperm.slane %v3201_v11, 2 }
 0x321   : > { %v989_v8 = vmul.f32 %v2647_v17, %v976_v60  ;;  %v3203_v21 = vadd.f32 1e-05, %v974_v12  ;;  %vm995_vm8 = vweird.f32 %v2647_v17 }
 0x322   : > { %v983_v19 = vmul.f32 %v2645_v34, %v982_v10  ;;  %vm996_vm10 = vmor %vm994_vm9, %vm995_vm8 }
 0x323   : > { %v990_v25 = vmul.f32 %v2647_v17, %v989_v8  ;;  %2648 = vrsqrt.f32 %v3203_v21  ;;  %vm1004_vm12 = vweird.f32 %v3203_v21  ;;  %v2459_v8 = vld [vmem:[#allocation9 + $0xcc] sm:$0xf] }
 0x324   : > { %v987_v24 = vsel %vm986_vm7, %v2645_v34, %v983_v19  ;;  %v2405_v34 = vld [vmem:[#allocation9 + $0x2d8] sm:$0xf0]  ;;  %v2388_v19 = vor.u32 %v2521_v4, %v2387_v2  ;;  %v2505_v2 = vld [vmem:[#allocation9 + $0x234] sm:$0xf0]  ;;  %v2487_v4 = vld [vmem:[#allocation9 + $0x1ac] sm:$0xf] }
 0x325   : > { %v1008_v29 = vmul.f32 %v987_v24, %v3170_v55  ;;  %v1011_v30 = vmul.f32 %v987_v24, %v3173_v26  ;;  %v991_v31 = vmul.f32 0.5, %v990_v25  ;;  %v1017_v55 = vperm.slane %v3201_v11, 1 }
 0x326   : > { %v2408_v1 = vor.u32 %v2523_v59, %v2405_v34  ;;  %v1032_v11 = vperm.slane %v3205_v22, 2  ;;  %v2357_v22 = vld [vmem:[#allocation9 + $0x278] sm:$0xf0]  ;;  %v2509_v59 = vld [vmem:[#allocation9 + $0x254] sm:$0xf0] }
 0x327   : > { %v1022_v47 = vmul.f32 %v1016_v23, %v1008_v29  ;;  %v1025_v32 = vmul.f32 %v1016_v23, %v1011_v30  ;;  %v992_v35 = vsub.f32 1.5, %v991_v31  ;;  %v2149_v23 = vld [vmem:[#allocation9 + $0xd8] sm:$0xf0]  ;;  %v2392_v29 = vor.u32 %v2519_v5, %v2389_v6  ;;  %v2371_v30 = vld [vmem:[#allocation9 + $0x288] sm:$0xf] }
 0x328   : > { %v2491_v34 = vld [vmem:[#allocation9 + $0x1cc] sm:$0xf]  ;;  %v2261_v5 = vld [vmem:[#allocation9 + $0x1b8] sm:$0xf0] }
 0x329   : > { %v1036_v39 = vadd.f32 %v1030_v43, %v1022_v47  ;;  %v1039_v42 = vadd.f32 %v1030_v43, %v1025_v32  ;;  %v2649_v38 = vpop.eup %2648  ;;  %v993_v44 = vmul.f32 %v2647_v17, %v992_v35  ;;  %v2517_v43 = vld [vmem:[#allocation9 + $0x294] sm:$0xf0]  ;;  %v2515_v47 = vld [vmem:[#allocation9 + $0x28c] sm:$0xf]  ;;  %v2373_v32 = vld [vmem:[#allocation9 + $0x298] sm:$0xf0]  ;;  %v2152_v35 = vor.u32 %v2459_v8, %v2149_v23 }
 0x32a   : > { %v999_v26 = vmul.f32 %v2649_v38, %v3203_v21  ;;  %vm1005_vm11 = vweird.f32 %v2649_v38  ;;  %v2376_v28 = vor.u32 %v2515_v47, %v2373_v32  ;;  %v2503_v6 = vld [vmem:[#allocation9 + $0x22c] sm:$0xf]  ;;  %v2307_v8 = vld [vmem:[#allocation9 + $0x208] sm:$0xf] }
 0x32b   : > { %v1042_v45 = vmax.f32 %v1036_v39, 0.0  ;;  %v1045_v37 = vmax.f32 %v1039_v42, 0.0  ;;  %v997_v18 = vsel %vm996_vm10, %v2647_v17, %v993_v44  ;;  %vm1006_vm13 = vmor %vm1004_vm12, %vm1005_vm11  ;;  %v2372_v42 = vor.u32 %v2517_v43, %v2371_v30  ;;  %v2245_v30 = vld [vmem:[#allocation9 + $0x198] sm:$0xf0]  ;;  %v2499_v43 = vld [vmem:[#allocation9 + $0x20c] sm:$0xf] }
 0x32c   : > { %v1009_v52 = vmul.f32 %v997_v18, %v3182_v40  ;;  %v1012_v53 = vmul.f32 %v997_v18, %v3185_v41  ;;  %v1000_v54 = vmul.f32 %v2649_v38, %v999_v26  ;;  %v2463_v40 = vld [vmem:[#allocation9 + $0xec] sm:$0xf]  ;;  %v2293_v26 = vld [vmem:[#allocation9 + $0x1f8] sm:$0xf0] }
 0x32d   : > { %v3217_v56 = vpack.c.bf16 %v1045_v37, %v1042_v45  ;;  %v2168_v17 = vor.u32 %v2463_v40, %v2165_v15  ;;  %v2511_v45 = vld [vmem:[#allocation9 + $0x26c] sm:$0xf]  ;;  %v2136_v37 = vor.u32 %v2455_v3, %v2133_v20  ;;  %v2053_v20 = vld [vmem:[#allocation9 + $0x18] sm:$0xf0] }
 0x32e   : > { %v1023_v60 = vmul.f32 %v1017_v55, %v1009_v52  ;;  %v1026_v61 = vmul.f32 %v1017_v55, %v1012_v53  ;;  %v1001_v63 = vmul.f32 0.5, %v1000_v54  ;;  %v2495_v55 = vld [vmem:[#allocation9 + $0x1ec] sm:$0xf]  ;;  %v2117_v52 = vld [vmem:[#allocation9 + $0x98] sm:$0xf0]  ;;  %v2360_v57 = vor.u32 %v2511_v45, %v2357_v22 }
 0x32f   : > { %1645 = vmatmul.bf16.vlgmr.msra.gmra.mxu2 %v3217_v56  ;;  %1687 = vmatmul.bf16.vlgmr.msrb.gmra.mxu1 %v3217_v56  ;;  %v2296_v50 = vor.u32 %v2495_v55, %v2293_v26  ;;  %v2339_v53 = vld [vmem:[#allocation9 + $0x248] sm:$0xf]  ;;  %v2447_v15 = vld [vmem:[#allocation9 + $0x6c] sm:$0xf]  ;;  %v2197_v45 = vld [vmem:[#allocation9 + $0x138] sm:$0xf0] }
 0x330   : > { %1749 = vmatpush.bf16.msra.mxu2 %v2420_v46  ;;  %1791 = vmatpush.bf16.msrb.mxu1 %v2424_v58  ;;  %v1002_v41 = vsub.f32 1.5, %v1001_v63  ;;  %v1037_v16 = vadd.f32 %v1031_v51, %v1023_v60  ;;  %v1040_v7 = vadd.f32 %v1031_v51, %v1026_v61  ;;  %v2451_v51 = vld [vmem:[#allocation9 + $0x8c] sm:$0xf]  ;;  %v2277_v60 = vld [vmem:[#allocation9 + $0x1d8] sm:$0xf0] }
 0x331   : > { %v2507_v61 = vld [vmem:[#allocation9 + $0x24c] sm:$0xf]  ;;  %v2341_v63 = vld [vmem:[#allocation9 + $0x258] sm:$0xf0]  ;;  %v2280_v40 = vor.u32 %v2491_v34, %v2277_v60 }
 0x332   : > { %v1003_v9 = vmul.f32 %v2649_v38, %v1002_v41  ;;  %v1043_v10 = vmax.f32 %v1037_v16, 0.0  ;;  %v1046_v12 = vmax.f32 %v1040_v7, 0.0  ;;  %v2101_v41 = vld [vmem:[#allocation9 + $0x78] sm:$0xf0]  ;;  %v2323_v16 = vld [vmem:[#allocation9 + $0x228] sm:$0xf]  ;;  %v2344_v7 = vor.u32 %v2507_v61, %v2341_v63 }
 0x333   : > { %v2435_v3 = vld [vmem:[#allocation9 + $0xc] sm:$0xf] }
 0x334   : > { %1750 = vmatpush.bf16.msra.mxu2 %v2404_v0  ;;  %1792 = vmatpush.bf16.msrb.mxu1 %v2408_v1  ;;  %v1007_v24 = vsel %vm1006_vm13, %v2649_v38, %v1003_v9  ;;  %v3223_v25 = vpack.c.bf16 %v1046_v12, %v1043_v10  ;;  %v2355_v38 = vld [vmem:[#allocation9 + $0x268] sm:$0xf]  ;;  %v2120_v0 = vor.u32 %v2451_v51, %v2117_v52  ;;  %v2325_v9 = vld [vmem:[#allocation9 + $0x238] sm:$0xf0]  ;;  %v2471_v26 = vld [vmem:[#allocation9 + $0x12c] sm:$0xf] }
 0x335   : > { %v1010_v31 = vmul.f32 %v1007_v24, %v3192_v14  ;;  %v1013_v21 = vmul.f32 %v1007_v24, %v3195_v62  ;;  %v2513_v62 = vld [vmem:[#allocation9 + $0x274] sm:$0xf0]  ;;  %v2340_v1 = vor.u32 %v2509_v59, %v2339_v53  ;;  %v2104_v10 = vor.u32 %v2447_v15, %v2101_v41 }
 0x336   : > { %1659 = vmatmul.bf16.vlgmr.msra.gmra.mxu3 %v3223_v25  ;;  %v2356_v58 = vor.u32 %v2513_v62, %v2355_v38  ;;  %v2324_v12 = vor.u32 %v2505_v2, %v2323_v16  ;;  %v2328_v23 = vor.u32 %v2503_v6, %v2325_v9  ;;  %v2501_v24 = vld [vmem:[#allocation9 + $0x214] sm:$0xf0]  ;;  %v2056_v62 = vor.u32 %v2435_v3, %v2053_v20 }
 0x337   : > { %v1024_v36 = vmul.f32 %v1018_v13, %v1010_v31  ;;  %v1027_v39 = vmul.f32 %v1018_v13, %v1013_v21  ;;  %1763 = vmatpush.bf16.msra.mxu3 %v2168_v17  ;;  %v2264_v13 = vor.u32 %v2487_v4, %v2261_v5  ;;  %v2443_v17 = vld [vmem:[#allocation9 + $0x4c] sm:$0xf]  ;;  %v2309_v31 = vld [vmem:[#allocation9 + $0x218] sm:$0xf0]  ;;  %v2308_v47 = vor.u32 %v2501_v24, %v2307_v8 }
 0x338   : > { %1751 = vmatpush.bf16.msra.mxu2 %v2388_v19  ;;  %1793 = vmatpush.bf16.msrb.mxu1 %v2392_v29  ;;  %v2085_v19 = vld [vmem:[#allocation9 + $0x58] sm:$0xf0]  ;;  %v2483_v29 = vld [vmem:[#allocation9 + $0x18c] sm:$0xf]  ;;  %v2200_v22 = vor.u32 %v2471_v26, %v2197_v45 }
 0x339   : > { %v1038_v14 = vadd.f32 %v1032_v11, %v1024_v36  ;;  %v1041_v44 = vadd.f32 %v1032_v11, %v1027_v39  ;;  %v2088_v21 = vor.u32 %v2443_v17, %v2085_v19  ;;  %v2248_v32 = vor.u32 %v2483_v29, %v2245_v30  ;;  %v2439_v11 = vld [vmem:[#allocation9 + $0x2c] sm:$0xf] }
 0x33a   : > { %v2312_v36 = vor.u32 %v2499_v43, %v2309_v31  ;;  %v2479_v39 = vld [vmem:[#allocation9 + $0x16c] sm:$0xf] }
 0x33b   : > { %1764 = vmatpush.bf16.msra.mxu3 %v2152_v35  ;;  %v1044_v18 = vmax.f32 %v1038_v14, 0.0  ;;  %v1047_v46 = vmax.f32 %v1041_v44, 0.0  ;;  %v2069_v35 = vld [vmem:[#allocation9 + $0x38] sm:$0xf0]  ;;  %v2475_v14 = vld [vmem:[#allocation9 + $0x14c] sm:$0xf] }
 0x33c   : > { %1752 = vmatpush.bf16.msra.mxu2 %v2372_v42  ;;  %1794 = vmatpush.bf16.msrb.mxu1 %v2376_v28  ;;  %v2229_v42 = vld [vmem:[#allocation9 + $0x178] sm:$0xf0]  ;;  %v2072_v28 = vor.u32 %v2439_v11, %v2069_v35 }
 0x33d   : > { %v3229_v54 = vpack.c.bf16 %v1047_v46, %v1044_v18  ;;  %v2232_v38 = vor.u32 %v2479_v39, %v2229_v42  ;;  %v2213_v44 = vld [vmem:[#allocation9 + $0x158] sm:$0xf0] }
 0x33e   : > { %v2216_v55 = vor.u32 %v2475_v14, %v2213_v44  ;;  %v2181_v18 = vld [vmem:[#allocation9 + $0x118] sm:$0xf0] }
 0x33f   : > { %1701 = vmatmul.bf16.vlgmr.msrb.gmra.mxu2 %v3223_v25  ;;  %1743 = vmatmul.bf16.vlgmr.msra.gmra.mxu1 %v3223_v25 }
 0x340   : > { %1765 = vmatpush.bf16.msra.mxu3 %v2136_v37  ;;  %1673 = vmatmul.bf16.vlgmr.msrb.gmra.mxu0 %v3229_v54  ;;  %v2467_v37 = vld [vmem:[#allocation9 + $0x10c] sm:$0xf] }
 0x341   : > { %1753 = vmatpush.bf16.msra.mxu2 %v2356_v58  ;;  %1777 = vmatpush.bf16.msrb.mxu0 %v2296_v50  ;;  %v2184_v46 = vor.u32 %v2467_v37, %v2181_v18 }
 0x342   : > { %1795 = vmatpush.bf16.msrb.mxu1 %v2360_v57 }
 0x344   : > { %1766 = vmatpush.bf16.msra.mxu3 %v2120_v0 }
 0x345   : > { %1754 = vmatpush.bf16.msra.mxu2 %v2340_v1  ;;  %1778 = vmatpush.bf16.msrb.mxu0 %v2280_v40 }
 0x346   : > { %1796 = vmatpush.bf16.msrb.mxu1 %v2344_v7  ;;  %1715 = vmatmul.bf16.vlgmr.msrb.gmra.mxu3 %v3229_v54 }
 0x348   : > { %1767 = vmatpush.bf16.msra.mxu3 %v2104_v10 }
 0x349   : > { %1755 = vmatpush.bf16.msra.mxu2 %v2324_v12  ;;  %1779 = vmatpush.bf16.msrb.mxu0 %v2264_v13 }
 0x34a   : > { %1797 = vmatpush.bf16.msrb.mxu1 %v2328_v23 }
 0x34c   : > { %1768 = vmatpush.bf16.msra.mxu3 %v2088_v21 }
 0x34d   : > { %1756 = vmatpush.bf16.msra.mxu2 %v2308_v47  ;;  %1780 = vmatpush.bf16.msrb.mxu0 %v2248_v32 }
 0x34e   : > { %1798 = vmatpush.bf16.msrb.mxu1 %v2312_v36 }
 0x350   : > { %1769 = vmatpush.bf16.msra.mxu3 %v2072_v28  ;;  %1729 = vmatmul.bf16.vlgmr.msra.gmra.mxu0 %v3217_v56 }
 0x351   : > { %1757 = vmatmul.bf16.vlgmr.msra.gmra.mxu2 %v3229_v54  ;;  %1799 = vmatmul.bf16.vlgmr.msrb.gmra.mxu1 %v3229_v54 }
 0x352   : > { %1781 = vmatpush.bf16.msrb.mxu0 %v2232_v38 }
 0x354   : > { %1770 = vmatpush.bf16.msra.mxu3 %v2056_v62 }
 0x356   : > { %1782 = vmatpush.bf16.msrb.mxu0 %v2216_v55 }
 0x357   : > { %1771 = vmatmul.bf16.vlgmr.msra.gmra.mxu3 %v3217_v56  ;;  %v3243_v56 = vld [vmem:[%s3297_s7] sm:$0xf] }
 0x358   : > { %v1150_v63 = vperm.slane %v3243_v56, 1  ;;  %v1149_v16 = vperm.slane %v3243_v56, 0  ;;  %v1151_v4 = vperm.slane %v3243_v56, 2 }
 0x35a   : > { %1783 = vmatpush.bf16.msrb.mxu0 %v2200_v22 }
 0x35e   : > { %1784 = vmatpush.bf16.msrb.mxu0 %v2184_v46 }
 0x361   : > { %1785 = vmatmul.bf16.vlgmr.msrb.gmra.mxu0 %v3223_v25 }
 0x3ac   : > { %v1688_v52 = vpop.f32.mrf.mxu1 }
 0x3ad   : > { %v1689_v25 = vadd.f32 %v1688_v52, %v1150_v63 }
 0x3b2   : > { %v1646_v58 = vpop.f32.mrf.mxu2 }
 0x3b3   : > { %v1647_v13 = vadd.f32 %v1646_v58, %v1149_v16 }
 0x3b4   : > { %v1690_v34 = vpop.f32.mrf.mxu1 }
 0x3b5   : > { %v1691_v1 = vadd.f32 %v1690_v34, %v1150_v63 }
 0x3b9   : > { %v1660_v50 = vpop.f32.mrf.mxu3 }
 0x3ba   : > { %v1648_v51 = vpop.f32.mrf.mxu2  ;;  %v1661_v23 = vadd.f32 %v1660_v50, %v1647_v13 }
 0x3bb   : > { %v1649_v6 = vadd.f32 %v1648_v51, %v1149_v16 }
 0x3bc   : > { %v1744_v40 = vpop.f32.mrf.mxu1 }
 0x3bd   : > { %v1674_v53 = vpop.f32.mrf.mxu0 }
 0x3be   : > { %v1675_v29 = vadd.f32 %v1674_v53, %v1661_v23 }
 0x3c1   : > { %v1662_v54 = vpop.f32.mrf.mxu3 }
 0x3c2   : > { %v1702_v57 = vpop.f32.mrf.mxu2  ;;  %v1663_v17 = vadd.f32 %v1662_v54, %v1649_v6 }
 0x3c3   : > { %v1703_v15 = vadd.f32 %v1702_v57, %v1689_v25 }
 0x3c4   : > { %v1746_v30 = vpop.f32.mrf.mxu1 }
 0x3c5   : > { %v1676_v59 = vpop.f32.mrf.mxu0 }
 0x3c6   : > { %v1677_v24 = vadd.f32 %v1676_v59, %v1663_v17  ;;  %v1152_v59 = vperm.slane %v3243_v56, 3 }
 0x3c8   : > { %v1805_v21 = vpack.c.bf16 %v1677_v24, %v1675_v29 }
 0x3c9   : > { %v1716_v60 = vpop.f32.mrf.mxu3 }
 0x3ca   : > { %v1704_v61 = vpop.f32.mrf.mxu2  ;;  %v1717_v2 = vadd.f32 %v1716_v60, %v1703_v15 }
 0x3cb   : > { %v1705_v41 = vadd.f32 %v1704_v61, %v1691_v1 }
 0x3cd   : > { %v1730_v0 = vpop.f32.mrf.mxu0 }
 0x3ce   : > { %v1731_v19 = vadd.f32 %v1730_v0, %v1151_v4  ;;  %v1800_v0 = vpop.f32.mrf.mxu1 }
 0x3d0   : > { %v1745_v43 = vadd.f32 %v1744_v40, %v1731_v19 }
 0x3d1   : > { %v1718_v7 = vpop.f32.mrf.mxu3 }
 0x3d2   : > { %v1719_v5 = vadd.f32 %v1718_v7, %v1705_v41 }
 0x3d4   : > { %v1758_v9 = vpop.f32.mrf.mxu2  ;;  %v1806_v10 = vpack.c.bf16 %v1719_v5, %v1717_v2 }
 0x3d5   : > { %v1732_v12 = vpop.f32.mrf.mxu0  ;;  %v1759_v32 = vadd.f32 %v1758_v9, %v1745_v43 }
 0x3d6   : > { %v1733_v8 = vadd.f32 %v1732_v12, %v1151_v4  ;;  %1815 = vmatpush.bf16.xpose.msrb.mxu2 %v1806_v10  ;;  %v1802_v7 = vpop.f32.mrf.mxu1 }
 0x3d8   : > { %v1747_v31 = vadd.f32 %v1746_v30, %v1733_v8 }
 0x3da   : > { %v1772_v57 = vpop.f32.mrf.mxu3 }
 0x3db   : > { %v1773_v61 = vadd.f32 %v1772_v57, %v1152_v59 }
 0x3dc   : > { %v1760_v47 = vpop.f32.mrf.mxu2 }
 0x3dd   : > { %v1761_v11 = vadd.f32 %v1760_v47, %v1747_v31  ;;  %1816 = vmatmul.bf16.vlgmr.msrb.gmra.mxu2 %v1805_v21 }
 0x3de   : > { %v1786_v34 = vpop.f32.mrf.mxu0 }
 0x3df   : > { %v1807_v35 = vpack.c.bf16 %v1761_v11, %v1759_v32  ;;  %v1787_v63 = vadd.f32 %v1786_v34, %v1773_v61 }
 0x3e1   : > { %1859 = vmatpush.bf16.msrb.mxu3 %v1807_v35  ;;  %v1801_v1 = vadd.f32 %v1800_v0, %v1787_v63 }
 0x3e2   : > { %v1774_v60 = vpop.f32.mrf.mxu3 }
 0x3e3   : > { %v1775_v41 = vadd.f32 %v1774_v60, %v1152_v59 }
 0x3e6   : > { %v1788_v15 = vpop.f32.mrf.mxu0 }
 0x3e7   : > { %v1789_v56 = vadd.f32 %v1788_v15, %v1775_v41 }
 0x3e9   : > { %v1803_v4 = vadd.f32 %v1802_v7, %v1789_v56 }
 0x460   : > { %v1817_v36 = vpop.f32.mrf.mxu2 }
 0x461   : > { %v1822_v39 = vmul.f32 0.35355338, %v1817_v36 }
 0x463   : > { %v1824_v42 = vadd.f32 %v3080_v27, %v1822_v39 }
 0x465   : > { %v1826_v28 = vsel %vm401_vm2, %v1824_v42, -inf }
 0x466   : > { %1827 = vmax.xlane.f32.xlu2 %v1826_v28 }
 0x468   : > { %v1819_v3 = vpop.f32.mrf.mxu2 }
 0x469   : > { %v1823_v20 = vmul.f32 0.35355338, %v1819_v3 }
 0x46b   : > { %v1825_v38 = vadd.f32 %v3084_v33, %v1823_v20 }
 0x46d   : > { %v1829_v14 = vsel %vm401_vm2, %v1825_v38, -inf }
 0x46e   : > { %1830 = vmax.xlane.f32.xlu0 %v1829_v14 }
 0x4d9   : > { %v1828_v44 = vpop.xlane.xlu2 %1827 }
 0x4da   : > { %v1832_v62 = vsub.f32 %v1824_v42, %v1828_v44 }
 0x4dc   : > { %v1834_v55 = vmul.f32 1.442695, %v1832_v62 }
 0x4de   : > { %2650 = vpow2.f32 %v1834_v55 }
 0x4e1   : > { %v1831_v26 = vpop.xlane.xlu0 %1830 }
 0x4e2   : > { %v1833_v45 = vsub.f32 %v1825_v38, %v1831_v26 }
 0x4e4   : > { %v2651_v22 = vpop.eup %2650  ;;  %v1836_v37 = vmul.f32 1.442695, %v1833_v45 }
 0x4e5   : > { %v1838_v27 = vsel %vm401_vm2, %v2651_v22, 0.0 }
 0x4e6   : > { %2652 = vpow2.f32 %v1836_v37  ;;  %1839 = vadd.xlane.f32.xlu1 %v1838_v27 }
 0x4ec   : > { %v2653_v18 = vpop.eup %2652 }
 0x4ed   : > { %v1841_v46 = vsel %vm401_vm2, %v2653_v18, 0.0 }
 0x4ee   : > { %1842 = vadd.xlane.f32.xlu2 %v1841_v46 }
 0x559   : > { %v1840_v33 = vpop.xlane.xlu1 %1839 }
 0x55a   : > { %2654 = vrcp.f32 %v1840_v33 }
 0x560   : > { %v2655_v50 = vpop.eup %2654 }
 0x561   : > { %v1843_v58 = vpop.xlane.xlu2 %1842  ;;  %v1846_v52 = vmul.f32 %v2655_v50, %v2651_v22 }
 0x562   : > { %2656 = vrcp.f32 %v1843_v58 }
 0x568   : > { %v2657_v51 = vpop.eup %2656 }
 0x569   : > { %v1847_v53 = vmul.f32 %v2657_v51, %v2653_v18 }
 0x56b   : > { %v1848_v54 = vpack.c.bf16 %v1847_v53, %v1846_v52 }
 0x56d   : > { %2425 = vmatmul.msk.bf16.vlgmr.msrb.gmra.mxu3 %vm401_vm2, %v1848_v54 }
 0x5f0   : > { %v1861_v25 = vpop.f32.mrf.mxu3 }
 0x5f1   : > { %v1866_v40 = vmul.f32 %v3134_v48, %v1861_v25 }
 0x5f3   : > { %v1868_v16 = vadd.f32 %v1866_v40, %v1801_v1 }
 0x5f5   : > { %1870 = vst [vmem:[%s374_s20] sm:$0xff] %v1868_v16 }
 0x5f8   : > { %v1863_v2 = vpop.f32.mrf.mxu3 }
 0x5f9   : > { %v1867_v5 = vmul.f32 %v3137_v49, %v1863_v2 }
 0x5fb   : > { %v1869_v48 = vadd.f32 %v1867_v5, %v1803_v4 }
 0x5fd   : > { %1871 = vst [vmem:[%s374_s20 + $0x8] sm:$0xff] %v1869_v48 }
 0x5fe   : > { %2805 = shalt.err (!%p2802_p8)
}
 0x5ff   : > { %s2861_s12 = smov 128   ;;  %s2862_s18 = smov 8  }
 0x600   : > { %2551 = dma.vmem_to_hbm [thread:$0]  (%p2946_p5), %s1886_s22, 256, %s1888_s25, %s1873_s9, %s2861_s12, %s2861_s12, %s2862_s18  }
 0x601 PF: > { %p2578_p9 = scmp.ge.s32.totalorder %s2852_s30, 2  ;;  %s1902_s2 = sand.u32 1, %s2840_s27  }
 0x602   : > { %s1903_s4 = scalar_lea.sflag [#allocation5], %s1902_s2 }
 0x603   : > { %p2567_p10 = pnand %p2578_p9, %p2950_p6 }
 0x605   : > { %p2568_p11 = pneg %p2567_p10 }
 0x607   : > { %2835 = dma.done.wait (%p2568_p11), %s1903_s4, 256  }
 0x608   : > { %2837 = vsyncadd (%p2568_p11), %s1903_s4, 4294967040  ;;  %p21_p12 = scmp.ge.s32.totalorder %s2933_s11, 6   ;;  %s3309_s27 = smov %s2844_s28 }
 0x609   : > { %s3310_s28 = smov %s2848_s29  ;;  %s3311_s29 = smov %s2944_s14 }
 0x60a   : > { %s3312_s30 = smov %s2933_s11  ;;  %23 = sbr.rel (!%p21_p12) target bundleno = 10 (0xa), region = 107 }
 0x60f   :  { %1909 = vsyncpa [#allocation4], 1 }
 0x610   :  { %1911 = vsyncpa [#allocation4 + $0x1], 1 }
 0x611   :  { %1912 = vsyncpa [#allocation7], 1 }
 0x612   :  { %1913 = vsyncpa [#allocation10], 1 }
 0x613   :  { %1914 = vsyncpa [#allocation5], 1 }
 0x614   :  { %1916 = vsyncpa [#allocation5 + $0x1], 1 }

</bundles_post_ra>
